<compile_context>
chip_gen: v7x
topology: tpu7x:2x2x1
jax: 0.10.0
libtpu: 0.0.40
codegen_flags: <defaults>
</compile_context>

<pallas_src>
import functools

import numpy as np
import jax
import jax.numpy as jnp
from jax import lax
from jax.experimental import pallas as pl
from jax.experimental.pallas import tpu as pltpu

KERNEL_SIZE = 4
STRIDE = 2
PADDING = 1
NEG_SLOPE = 0.1
LANE = 128  # lane width / halo block width along L


def _upsample_kernel(x_ref, xp_ref, xn_ref, wt_ref, b_ref, scat_ref, fm_ref, out_ref):
    # x_ref   : (1, C_in, TL)        current L-tile of x (compute dtype)
    # xp_ref  : (1, C_in, HL)        lane block ending at column j*TL - 1   (prev halo)
    # xn_ref  : (1, C_in, HL)        lane block starting at column (j+1)*TL (next halo)
    # wt_ref  : (4, C_out, C_in)     transposed taps w[:, :, k].T
    # b_ref   : (C_out, 1)           bias (f32)
    # scat_ref: (2, CH, 2*CH)        0/1 even/odd scatter matrices (f32)
    # fm_ref  : (1, C_fm, 2*TL)      skip-connection tile (f32)
    # out_ref : (1, C_out + C_fm, 2*TL)
    j = pl.program_id(1)
    n_tiles = pl.num_programs(1)

    x = x_ref[0]                                   # (C_in, TL)
    c_in, tl = x.shape
    c_out = wt_ref.shape[1]
    halo_l = xp_ref.shape[-1]

    # One-column halos from neighbouring tiles; zero at the true sequence ends.
    prev_col = xp_ref[0, :, halo_l - 1:halo_l]     # x[:, j*TL - 1]
    next_col = xn_ref[0, :, 0:1]                   # x[:, (j+1)*TL]
    prev_col = jnp.where(j > 0, prev_col, jnp.zeros_like(prev_col))
    next_col = jnp.where(j < n_tiles - 1, next_col, jnp.zeros_like(next_col))

    # Shifted copies of x: lane roll (XLU) + boundary fix-up (VPU select).
    lane = lax.broadcasted_iota(jnp.int32, (c_in, tl), 1)
    x_prev = jnp.where(lane == 0, prev_col, pltpu.roll(x, shift=1, axis=1))        # x[:, i-1]
    x_next = jnp.where(lane == tl - 1, next_col, pltpu.roll(x, shift=tl - 1, axis=1))  # x[:, i+1]

    # Conv dots: exact (HIGHEST) only needed for the f32 path; bf16 is native MXU.
    conv_prec = (lax.Precision.HIGHEST if x_ref.dtype == jnp.float32
                 else lax.Precision.DEFAULT)
    cdot = functools.partial(jnp.dot, preferred_element_type=jnp.float32,
                             precision=conv_prec)
    w0t, w1t, w2t, w3t = wt_ref[0], wt_ref[1], wt_ref[2], wt_ref[3]   # (C_out, C_in)
    even = cdot(w1t, x) + cdot(w3t, x_prev)        # (C_out, TL) f32
    odd = cdot(w2t, x) + cdot(w0t, x_next)         # (C_out, TL) f32

    # Interleave the parities along lanes with 0/1 scatter matmuls (exact under
    # HIGHEST: every output column is 1*value + zeros), then bias + LeakyReLU
    # epilogue in f32 and a dense, lane-aligned store per 256-lane chunk.
    sdot = functools.partial(jnp.dot, preferred_element_type=jnp.float32,
                             precision=lax.Precision.HIGHEST)
    se = scat_ref[0]                               # (CH, 2*CH)
    so = scat_ref[1]
    ch = se.shape[0]
    bias = b_ref[...]                              # (C_out, 1) f32
    for c in range(tl // ch):                      # small static loop (<= TL/128 iters)
        e = even[:, c * ch:(c + 1) * ch]
        o = odd[:, c * ch:(c + 1) * ch]
        y = sdot(e, se) + sdot(o, so) + bias       # (C_out, 2*CH)
        y = jnp.where(y > 0, y, NEG_SLOPE * y)
        out_ref[0, 0:c_out, 2 * c * ch:2 * (c + 1) * ch] = y.astype(out_ref.dtype)

    # Skip-connection passthrough: pure lane-dense sublane-slab copy.
    out_ref[0, c_out:, :] = fm_ref[0].astype(out_ref.dtype)


def _pick_tile_l(L, N, C_in, C_fm, C_total, x_isz, budget_bytes):
    """Largest L-tile (multiple of 128 dividing L) whose double-buffered working set
    fits the VMEM budget; prefers an even tile count when N is odd (v7x has 2 TCs)."""
    if L % LANE != 0:
        return L  # single full-length tile (block dims equal full array dims)
    cands = sorted((t for t in range(LANE, min(L, 2048) + 1, LANE) if L % t == 0),
                   reverse=True)

    def need(t):
        halo_l = min(LANE, t)
        per_step = (C_in * t * x_isz + 2 * C_in * halo_l * x_isz
                    + C_fm * 2 * t * 4 + C_total * 2 * t * 4)
        return 2 * per_step  # double-buffered

    fitting = [t for t in cands if need(t) <= budget_bytes] or [cands[-1]]
    if N % 2 == 1:
        even_grid = [t for t in fitting if (L // t) % 2 == 0]
        if even_grid:
            return even_grid[0]
    return fitting[0]


def upsample_forward(x, w, b, fm, *, tile_l=None, vmem_budget_bytes=20 * 1024 * 1024):
    """x: (N, C_in, L); w: (C_in, C_out, 4) [torch ConvTranspose1d layout]; b: (C_out,);
    fm: (N, C_fm, 2*L).  Returns (N, C_out + C_fm, 2*L) f32 (PyTorch NCL layout).

    The MXU compute dtype follows x.dtype (pass bf16 activations for the perf path
    on all generations; accumulation is always f32)."""
    N, C_in, L = x.shape
    assert w.shape[0] == C_in and w.shape[2] == KERNEL_SIZE
    C_out = w.shape[1]
    L_out = (L - 1) * STRIDE - 2 * PADDING + KERNEL_SIZE
    assert L_out == 2 * L
    C_fm = fm.shape[1]
    assert fm.shape == (N, C_fm, L_out)
    C_total = C_out + C_fm

    compute_dtype = x.dtype
    x_isz = jnp.dtype(compute_dtype).itemsize
    out_dtype = jnp.float32

    if tile_l is None:
        tile_l = _pick_tile_l(L, N, C_in, C_fm, C_total, x_isz, vmem_budget_bytes)
    assert L % tile_l == 0 and (tile_l % LANE == 0 or tile_l == L)
    n_tiles = L // tile_l
    halo_l = LANE if tile_l % LANE == 0 else tile_l
    bpt = tile_l // halo_l          # halo blocks per tile
    last_blk = L // halo_l - 1

    # Constant 0/1 scatter matrices (even/odd lane interleave), 128-column chunks.
    chunk = LANE if tile_l % LANE == 0 else tile_l
    ar = np.arange(chunk)[:, None]
    ac = np.arange(2 * chunk)[None, :]
    scat = jnp.asarray(np.stack([(ac == 2 * ar), (ac == 2 * ar + 1)]).astype(np.float32))

    # Transposed taps (tiny tensor; the only host-side rearrangement).
    wt = jnp.transpose(w, (2, 1, 0)).astype(compute_dtype)          # (4, C_out, C_in)
    b2 = jnp.reshape(b, (C_out, 1)).astype(jnp.float32)
    fm = fm.astype(out_dtype)

    # VMEM budget -> compiler limit (generous headroom; default working set is small).
    per_step = (C_in * tile_l * x_isz + 2 * C_in * halo_l * x_isz
                + C_fm * 2 * tile_l * 4 + C_total * 2 * tile_l * 4)
    need = 2 * per_step + scat.size * 4 + wt.size * x_isz + C_out * 4
    vmem_limit = int(min(max(2 * need + (1 << 20), 32 << 20), 100 << 20))

    out = pl.pallas_call(
        _upsample_kernel,
        out_shape=jax.ShapeDtypeStruct((N, C_total, L_out), out_dtype),
        grid=(N, n_tiles),
        in_specs=[
            # current x tile
            pl.BlockSpec((1, C_in, tile_l), lambda n, j: (n, 0, j)),
            # prev halo: lane block whose last column is x[:, j*TL - 1] (clamped at j==0)
            pl.BlockSpec((1, C_in, halo_l),
                         lambda n, j: (n, 0, jnp.maximum(j * bpt - 1, 0))),
            # next halo: lane block whose first column is x[:, (j+1)*TL] (clamped at end)
            pl.BlockSpec((1, C_in, halo_l),
                         lambda n, j: (n, 0, jnp.minimum((j + 1) * bpt, last_blk))),
            pl.BlockSpec((KERNEL_SIZE, C_out, C_in), lambda n, j: (0, 0, 0)),
            pl.BlockSpec((C_out, 1), lambda n, j: (0, 0)),
            pl.BlockSpec((2, chunk, 2 * chunk), lambda n, j: (0, 0, 0)),
            pl.BlockSpec((1, C_fm, 2 * tile_l), lambda n, j: (n, 0, j)),
        ],
        out_specs=pl.BlockSpec((1, C_total, 2 * tile_l), lambda n, j: (n, 0, j)),
        compiler_params=pltpu.CompilerParams(
            dimension_semantics=("parallel", "parallel"),
            vmem_limit_bytes=vmem_limit),
    )(x, x, x, wt, b2, scat, fm)
    return out


def _ref_forward(x, w, b, fm):
    """Pure numpy reference matching torch ConvTranspose1d + LeakyReLU + cat."""
    xn, wn, bn, fmn = (np.asarray(a, np.float32) for a in (x, w, b, fm))
    N, C_in, L = xn.shape
    C_out = wn.shape[1]
    L_out = (L - 1) * STRIDE - 2 * PADDING + KERNEL_SIZE
    y = np.zeros((N, C_out, L_out), np.float32)
    for i in range(L):
        for k in range(KERNEL_SIZE):
            t = i * STRIDE - PADDING + k
            if 0 <= t < L_out:
                y[:, :, t] += np.einsum("nc,cd->nd", xn[:, :, i], wn[:, :, k])
    y += bn[None, :, None]
    y = np.where(y > 0, y, NEG_SLOPE * y)
    return np.concatenate([y, fmn], axis=1)


if __name__ == "__main__":
    key = jax.random.PRNGKey(0)
    k1, k2, k3, k4 = jax.random.split(key, 4)

    N, C_in, C_out, C_fm, L = 2, 4, 8, 8, 256
    L_out = 2 * L

    x = jax.random.normal(k1, (N, C_in, L), jnp.float32)
    # nn.ConvTranspose1d weight shape: (in_channels, out_channels, kernel_size)
    w = 0.1 * jax.random.normal(k2, (C_in, C_out, KERNEL_SIZE), jnp.float32)
    b = 0.1 * jax.random.normal(k3, (C_out,), jnp.float32)
    fm = jax.random.normal(k4, (N, C_fm, L_out), jnp.float32)

    ref = _ref_forward(x, w, b, fm)

    # Exact f32 path, two L-tiles (exercises the halo logic across the tile boundary).
    out_2t = jax.block_until_ready(upsample_forward(x, w, b, fm, tile_l=128))
    assert out_2t.shape == (N, C_out + C_fm, L_out)
    np.testing.assert_allclose(np.asarray(out_2t), ref, rtol=1e-5, atol=1e-5)

    # Exact f32 path, default (VMEM-budgeted) tile picker.
    out_1t = jax.block_until_ready(upsample_forward(x, w, b, fm))
    np.testing.assert_allclose(np.asarray(out_1t), ref, rtol=1e-5, atol=1e-5)

    # Default perf path: bf16 activations/weights on the MXU, f32 accumulation.
    out_bf = jax.block_until_ready(
        upsample_forward(x.astype(jnp.bfloat16), w, b, fm, tile_l=128))
    x_bf = np.asarray(x.astype(jnp.bfloat16).astype(jnp.float32))
    w_bf = np.asarray(w.astype(jnp.bfloat16).astype(jnp.float32))
    ref_bf = _ref_forward(x_bf, w_bf, b, fm)
    np.testing.assert_allclose(np.asarray(out_bf), ref_bf, rtol=1e-4, atol=1e-4)

    print("KERNEL_OK")
</pallas_src>

<mosaic_0001>
module attributes {stable_mosaic.version = 11 : i64} {
  func.func @_upsample_kernel(%arg0: i32, %arg1: i32, %arg2: memref<1x4x128xf32, #tpu.memory_space<vmem>>, %arg3: memref<1x4x128xf32, #tpu.memory_space<vmem>>, %arg4: memref<1x4x128xf32, #tpu.memory_space<vmem>>, %arg5: memref<4x8x4xf32, #tpu.memory_space<vmem>>, %arg6: memref<8x1xf32, #tpu.memory_space<vmem>>, %arg7: memref<2x128x256xf32, #tpu.memory_space<vmem>>, %arg8: memref<1x8x256xf32, #tpu.memory_space<vmem>>, %arg9: memref<1x16x256xf32, #tpu.memory_space<vmem>>) attributes {dimension_semantics = [#tpu.dimension_semantics<parallel>, #tpu.dimension_semantics<parallel>], iteration_bounds = array<i64: 2, 2>, scalar_prefetch = 0 : i64, scratch_operands = 0 : i64, tpu.core_type = #tpu.core_type<tc>, window_params = [{transform_indices = @transform_0, window_bounds = array<i64: 1, 4, 128>}, {transform_indices = @transform_1, window_bounds = array<i64: 1, 4, 128>}, {transform_indices = @transform_2, window_bounds = array<i64: 1, 4, 128>}, {pipeline_mode = #tpu.pipeline_mode<synchronous>, transform_indices = @transform_3, window_bounds = array<i64: 4, 8, 4>}, {pipeline_mode = #tpu.pipeline_mode<synchronous>, transform_indices = @transform_4, window_bounds = array<i64: 8, 1>}, {pipeline_mode = #tpu.pipeline_mode<synchronous>, transform_indices = @transform_5, window_bounds = array<i64: 2, 128, 256>}, {transform_indices = @transform_6, window_bounds = array<i64: 1, 8, 256>}, {transform_indices = @transform_7, window_bounds = array<i64: 1, 16, 256>}]} {
    %c0 = arith.constant 0 : index
    %c0_0 = arith.constant 0 : index
    %c0_1 = arith.constant 0 : index
    %0 = vector.load %arg2[%c0, %c0_0, %c0_1] : memref<1x4x128xf32, #tpu.memory_space<vmem>>, vector<1x4x128xf32>
    %1 = vector.shape_cast %0 : vector<1x4x128xf32> to vector<4x128xf32>
    %c0_2 = arith.constant 0 : index
    %c0_3 = arith.constant 0 : index
    %c127 = arith.constant 127 : index
    %2 = vector.load %arg3[%c0_2, %c0_3, %c127] : memref<1x4x128xf32, #tpu.memory_space<vmem>>, vector<1x4x1xf32>
    %3 = vector.shape_cast %2 : vector<1x4x1xf32> to vector<4x1xf32>
    %c0_4 = arith.constant 0 : index
    %c0_5 = arith.constant 0 : index
    %c0_6 = arith.constant 0 : index
    %4 = vector.load %arg4[%c0_4, %c0_5, %c0_6] : memref<1x4x128xf32, #tpu.memory_space<vmem>>, vector<1x4x1xf32>
    %5 = vector.shape_cast %4 : vector<1x4x1xf32> to vector<4x1xf32>
    %c0_i32 = arith.constant 0 : i32
    %6 = arith.cmpi sgt, %arg1, %c0_i32 : i32
    %cst = arith.constant 0.000000e+00 : f32
    %7 = vector.broadcast %cst : f32 to vector<4x1xf32>
    %8 = arith.select %6, %3, %7 : vector<4x1xf32>
    %c1_i32 = arith.constant 1 : i32
    %9 = arith.cmpi slt, %arg1, %c1_i32 : i32
    %cst_7 = arith.constant 0.000000e+00 : f32
    %10 = vector.broadcast %cst_7 : f32 to vector<4x1xf32>
    %11 = arith.select %9, %5, %10 : vector<4x1xf32>
    %12 = tpu.iota {dimensions = array<i32: 1>} : vector<4x128xi32>
    %c0_i32_8 = arith.constant 0 : i32
    %13 = vector.broadcast %c0_i32_8 : i32 to vector<4x128xi32>
    %14 = arith.cmpi eq, %12, %13 : vector<4x128xi32>
    %c1_i32_9 = arith.constant 1 : i32
    %15 = tpu.dynamic_rotate %1 by %c1_i32_9 dim 1 : vector<4x128xf32>, i32 -> vector<4x128xf32>
    %16 = vector.shape_cast %8 : vector<4x1xf32> to vector<4x1xf32>
    %17 = vector.broadcast %16 : vector<4x1xf32> to vector<4x128xf32>
    %18 = arith.select %14, %17, %15 : vector<4x128xi1>, vector<4x128xf32>
    %c127_i32 = arith.constant 127 : i32
    %19 = vector.broadcast %c127_i32 : i32 to vector<4x128xi32>
    %20 = arith.cmpi eq, %12, %19 : vector<4x128xi32>
    %c127_i32_10 = arith.constant 127 : i32
    %21 = tpu.dynamic_rotate %1 by %c127_i32_10 dim 1 : vector<4x128xf32>, i32 -> vector<4x128xf32>
    %22 = vector.shape_cast %11 : vector<4x1xf32> to vector<4x1xf32>
    %23 = vector.broadcast %22 : vector<4x1xf32> to vector<4x128xf32>
    %24 = arith.select %20, %23, %21 : vector<4x128xi1>, vector<4x128xf32>
    %c0_11 = arith.constant 0 : index
    %c0_12 = arith.constant 0 : index
    %c0_13 = arith.constant 0 : index
    %25 = vector.load %arg5[%c0_11, %c0_12, %c0_13] : memref<4x8x4xf32, #tpu.memory_space<vmem>>, vector<1x8x4xf32>
    %26 = vector.shape_cast %25 : vector<1x8x4xf32> to vector<8x4xf32>
    %c1 = arith.constant 1 : index
    %c0_14 = arith.constant 0 : index
    %c0_15 = arith.constant 0 : index
    %27 = vector.load %arg5[%c1, %c0_14, %c0_15] : memref<4x8x4xf32, #tpu.memory_space<vmem>>, vector<1x8x4xf32>
    %28 = vector.shape_cast %27 : vector<1x8x4xf32> to vector<8x4xf32>
    %c2 = arith.constant 2 : index
    %c0_16 = arith.constant 0 : index
    %c0_17 = arith.constant 0 : index
    %29 = vector.load %arg5[%c2, %c0_16, %c0_17] : memref<4x8x4xf32, #tpu.memory_space<vmem>>, vector<1x8x4xf32>
    %30 = vector.shape_cast %29 : vector<1x8x4xf32> to vector<8x4xf32>
    %c3 = arith.constant 3 : index
    %c0_18 = arith.constant 0 : index
    %c0_19 = arith.constant 0 : index
    %31 = vector.load %arg5[%c3, %c0_18, %c0_19] : memref<4x8x4xf32, #tpu.memory_space<vmem>>, vector<1x8x4xf32>
    %32 = vector.shape_cast %31 : vector<1x8x4xf32> to vector<8x4xf32>
    %cst_20 = arith.constant dense<0.000000e+00> : vector<8x128xf32>
    %33 = tpu.matmul %28, %1, %cst_20 {dimension_numbers = #tpu.dot_dimension_numbers<[1], [0], [0], [1], [0, 0, 1, 1], [], []>, precision = #tpu.contract_precision<fp32>} : vector<8x4xf32>, vector<4x128xf32>, vector<8x128xf32> -> vector<8x128xf32>
    %cst_21 = arith.constant dense<0.000000e+00> : vector<8x128xf32>
    %34 = tpu.matmul %32, %18, %cst_21 {dimension_numbers = #tpu.dot_dimension_numbers<[1], [0], [0], [1], [0, 0, 1, 1], [], []>, precision = #tpu.contract_precision<fp32>} : vector<8x4xf32>, vector<4x128xf32>, vector<8x128xf32> -> vector<8x128xf32>
    %35 = arith.addf %33, %34 : vector<8x128xf32>
    %cst_22 = arith.constant dense<0.000000e+00> : vector<8x128xf32>
    %36 = tpu.matmul %30, %1, %cst_22 {dimension_numbers = #tpu.dot_dimension_numbers<[1], [0], [0], [1], [0, 0, 1, 1], [], []>, precision = #tpu.contract_precision<fp32>} : vector<8x4xf32>, vector<4x128xf32>, vector<8x128xf32> -> vector<8x128xf32>
    %cst_23 = arith.constant dense<0.000000e+00> : vector<8x128xf32>
    %37 = tpu.matmul %26, %24, %cst_23 {dimension_numbers = #tpu.dot_dimension_numbers<[1], [0], [0], [1], [0, 0, 1, 1], [], []>, precision = #tpu.contract_precision<fp32>} : vector<8x4xf32>, vector<4x128xf32>, vector<8x128xf32> -> vector<8x128xf32>
    %38 = arith.addf %36, %37 : vector<8x128xf32>
    %c0_24 = arith.constant 0 : index
    %c0_25 = arith.constant 0 : index
    %c0_26 = arith.constant 0 : index
    %39 = vector.load %arg7[%c0_24, %c0_25, %c0_26] : memref<2x128x256xf32, #tpu.memory_space<vmem>>, vector<1x128x256xf32>
    %40 = vector.shape_cast %39 : vector<1x128x256xf32> to vector<128x256xf32>
    %c1_27 = arith.constant 1 : index
    %c0_28 = arith.constant 0 : index
    %c0_29 = arith.constant 0 : index
    %41 = vector.load %arg7[%c1_27, %c0_28, %c0_29] : memref<2x128x256xf32, #tpu.memory_space<vmem>>, vector<1x128x256xf32>
    %42 = vector.shape_cast %41 : vector<1x128x256xf32> to vector<128x256xf32>
    %c0_30 = arith.constant 0 : index
    %c0_31 = arith.constant 0 : index
    %43 = vector.load %arg6[%c0_30, %c0_31] : memref<8x1xf32, #tpu.memory_space<vmem>>, vector<8x1xf32>
    %cst_32 = arith.constant dense<0.000000e+00> : vector<8x256xf32>
    %44 = tpu.matmul %35, %40, %cst_32 {dimension_numbers = #tpu.dot_dimension_numbers<[1], [0], [0], [1], [0, 0, 1, 1], [], []>, precision = #tpu.contract_precision<fp32>} : vector<8x128xf32>, vector<128x256xf32>, vector<8x256xf32> -> vector<8x256xf32>
    %cst_33 = arith.constant dense<0.000000e+00> : vector<8x256xf32>
    %45 = tpu.matmul %38, %42, %cst_33 {dimension_numbers = #tpu.dot_dimension_numbers<[1], [0], [0], [1], [0, 0, 1, 1], [], []>, precision = #tpu.contract_precision<fp32>} : vector<8x128xf32>, vector<128x256xf32>, vector<8x256xf32> -> vector<8x256xf32>
    %46 = arith.addf %44, %45 : vector<8x256xf32>
    %47 = vector.broadcast %43 : vector<8x1xf32> to vector<8x256xf32>
    %48 = arith.addf %46, %47 : vector<8x256xf32>
    %cst_34 = arith.constant 0.000000e+00 : f32
    %49 = vector.broadcast %cst_34 : f32 to vector<8x256xf32>
    %50 = arith.cmpf ogt, %48, %49 : vector<8x256xf32>
    %cst_35 = arith.constant 1.000000e-01 : f32
    %51 = vector.broadcast %cst_35 : f32 to vector<8x256xf32>
    %52 = arith.mulf %51, %48 : vector<8x256xf32>
    %53 = arith.select %50, %48, %52 : vector<8x256xi1>, vector<8x256xf32>
    %c0_36 = arith.constant 0 : index
    %c0_37 = arith.constant 0 : index
    %c0_38 = arith.constant 0 : index
    %54 = vector.load %arg9[%c0_36, %c0_37, %c0_38] : memref<1x16x256xf32, #tpu.memory_space<vmem>>, vector<1x8x256xf32>
    %55 = vector.shape_cast %54 : vector<1x8x256xf32> to vector<8x256xf32>
    %56 = vector.shape_cast %53 : vector<8x256xf32> to vector<1x8x256xf32>
    tpu.vector_store %arg9[%c0_36, %c0_37, %c0_38], %56 {strides = array<i32>} : memref<1x16x256xf32, #tpu.memory_space<vmem>>, vector<1x8x256xf32>,
    %c0_39 = arith.constant 0 : index
    %c0_40 = arith.constant 0 : index
    %c0_41 = arith.constant 0 : index
    %57 = vector.load %arg8[%c0_39, %c0_40, %c0_41] : memref<1x8x256xf32, #tpu.memory_space<vmem>>, vector<1x8x256xf32>
    %58 = vector.shape_cast %57 : vector<1x8x256xf32> to vector<8x256xf32>
    %c0_42 = arith.constant 0 : index
    %c8 = arith.constant 8 : index
    %c0_43 = arith.constant 0 : index
    %59 = vector.load %arg9[%c0_42, %c8, %c0_43] : memref<1x16x256xf32, #tpu.memory_space<vmem>>, vector<1x8x256xf32>
    %60 = vector.shape_cast %59 : vector<1x8x256xf32> to vector<8x256xf32>
    %61 = vector.shape_cast %58 : vector<8x256xf32> to vector<1x8x256xf32>
    tpu.vector_store %arg9[%c0_42, %c8, %c0_43], %61 {strides = array<i32>} : memref<1x16x256xf32, #tpu.memory_space<vmem>>, vector<1x8x256xf32>,
    return
  }
  func.func @transform_0(%arg0: i32, %arg1: i32) -> (i32, i32, i32) {
    %c0_i32 = arith.constant 0 : i32
    %c0_i32_0 = arith.constant 0 : i32
    return %arg0, %c0_i32, %arg1 : i32, i32, i32
  }
  func.func @transform_1(%arg0: i32, %arg1: i32) -> (i32, i32, i32) {
    %c1_i32 = arith.constant 1 : i32
    %0 = arith.muli %arg1, %c1_i32 : i32
    %c1_i32_0 = arith.constant 1 : i32
    %1 = arith.subi %0, %c1_i32_0 : i32
    %c0_i32 = arith.constant 0 : i32
    %2 = arith.maxsi %1, %c0_i32 : i32
    %c0_i32_1 = arith.constant 0 : i32
    %c0_i32_2 = arith.constant 0 : i32
    return %arg0, %c0_i32_1, %2 : i32, i32, i32
  }
  func.func @transform_2(%arg0: i32, %arg1: i32) -> (i32, i32, i32) {
    %c1_i32 = arith.constant 1 : i32
    %0 = arith.addi %arg1, %c1_i32 : i32
    %c1_i32_0 = arith.constant 1 : i32
    %1 = arith.muli %0, %c1_i32_0 : i32
    %c1_i32_1 = arith.constant 1 : i32
    %2 = arith.minsi %1, %c1_i32_1 : i32
    %c0_i32 = arith.constant 0 : i32
    %c0_i32_2 = arith.constant 0 : i32
    return %arg0, %c0_i32, %2 : i32, i32, i32
  }
  func.func @transform_3(%arg0: i32, %arg1: i32) -> (i32, i32, i32) {
    %c0_i32 = arith.constant 0 : i32
    %c0_i32_0 = arith.constant 0 : i32
    %c0_i32_1 = arith.constant 0 : i32
    %c0_i32_2 = arith.constant 0 : i32
    return %c0_i32, %c0_i32_0, %c0_i32_1 : i32, i32, i32
  }
  func.func @transform_4(%arg0: i32, %arg1: i32) -> (i32, i32) {
    %c0_i32 = arith.constant 0 : i32
    %c0_i32_0 = arith.constant 0 : i32
    %c0_i32_1 = arith.constant 0 : i32
    return %c0_i32, %c0_i32_0 : i32, i32
  }
  func.func @transform_5(%arg0: i32, %arg1: i32) -> (i32, i32, i32) {
    %c0_i32 = arith.constant 0 : i32
    %c0_i32_0 = arith.constant 0 : i32
    %c0_i32_1 = arith.constant 0 : i32
    %c0_i32_2 = arith.constant 0 : i32
    return %c0_i32, %c0_i32_0, %c0_i32_1 : i32, i32, i32
  }
  func.func @transform_6(%arg0: i32, %arg1: i32) -> (i32, i32, i32) {
    %c0_i32 = arith.constant 0 : i32
    %c0_i32_0 = arith.constant 0 : i32
    return %arg0, %c0_i32, %arg1 : i32, i32, i32
  }
  func.func @transform_7(%arg0: i32, %arg1: i32) -> (i32, i32, i32) {
    %c0_i32 = arith.constant 0 : i32
    %c0_i32_0 = arith.constant 0 : i32
    return %arg0, %c0_i32, %arg1 : i32, i32, i32
  }
}

</mosaic_0001>

<bundles_post_ra>
// kernel: tpu_custom_call.1
= control target key start
LH: loop header
LB: loop body
LE: loop exit
PB: predicated region body
PF: predicated region fallthrough
CT: control target
= control target key end

     0   :  { %s7350_s0 = inlined_call_operand.hbm [shape: f32[2,4,256], index: 0, kind: input, shape index: {}]   ;;  %s7351_s1 = inlined_call_operand.hbm [shape: f32[2,4,256], index: 1, kind: input, shape index: {}]   ;;  %s7352_s2 = inlined_call_operand.hbm [shape: f32[2,4,256], index: 2, kind: input, shape index: {}]   ;;  %s7353_s3 = inlined_call_operand.vmem [shape: f32[4,8,4], index: 3, kind: input, shape index: {}]   ;;  %s7354_s4 = inlined_call_operand.vmem [shape: f32[8,1], index: 4, kind: input, shape index: {}]   ;;  %s7355_s5 = inlined_call_operand.hbm [shape: f32[2,128,256], index: 5, kind: input, shape index: {}]   ;;  %s7356_s6 = inlined_call_operand.vmem [shape: f32[2,8,512], index: 6, kind: input, shape index: {}]   ;;  %s7357_s7 = inlined_call_operand.hbm [shape: f32[2,16,512], index: 7, kind: output, shape index: {}]  }
   0x1   :  { %7634 = sst [smem:[#allocation124_spill]] %s7350_s0 }
   0x2   :  { %7635 = sst [smem:[#allocation125_spill]] %s7351_s1 }
   0x3   :  { %7636 = sst [smem:[#allocation126_spill]] %s7353_s3 }
   0x4   :  { %7637 = sst [smem:[#allocation127_spill]] %s7354_s4 }
   0x5   :  { %7638 = sst [smem:[#allocation128_spill]] %s7355_s5 }
   0x6   :  { %7639 = sst [smem:[#allocation129_spill]] %s7356_s6 }
   0x7   :  { %7640 = sst [smem:[#allocation130_spill]] %s7357_s7 }
   0x8   :  { %12 = vsyncpa [#allocation3], 0 }
   0x9   :  { %14 = vsyncpa [#allocation3 + $0x1], 0 }
   0xa   :  { %15 = vsyncpa [#allocation6], 0 }
   0xb   :  { %17 = vsyncpa [#allocation6 + $0x1], 0 }
   0xc   :  { %18 = vsyncpa [#allocation9], 0 }
   0xd   :  { %19 = vsyncpa [#allocation4], 0 }
   0xe   :  { %21 = vsyncpa [#allocation4 + $0x1], 0  ;;  %s5441_s24 = smov 0   ;;  %s5443_s25 = smov 0  }
   0xf   :  { %s5445_s26 = smov 0   ;;  %s5447_s27 = smov 0  }
  0x10   :  { %s5449_s28 = smov 0   ;;  %s5451_s29 = smov 0  }
  0x11   :  { %s5453_s30 = smov 0   ;;  %s5455_s8 = smov 0  }
  0x12   :  { %s5457_s9 = smov 0   ;;  %s5459_s10 = smov 0  }
  0x13   :  { %s5461_s11 = smov 0   ;;  %s5463_s12 = smov 0  }
  0x14   :  { %s5465_s13 = smov 0   ;;  %s5467_s14 = smov 0  }
  0x15 LB: > { %7641 = sst [smem:[#allocation16_spill]] %s5367_s10  ;;  %s5510_s15 = sadd.s32 4294967295, %s5383_s14   ;;  %s5383_s14 = sphi %s5467_s14, %s27_s14   ;;  %s5379_s13 = sphi %s5465_s13, %s8166_s13   ;;  %s5375_s12 = sphi %s5463_s12, %s8165_s12   ;;  %s5371_s11 = sphi %s5461_s11, %s8164_s11   ;;  %s5367_s10 = sphi %s5459_s10, %s8163_s10   ;;  %s5363_s9 = sphi %s5457_s9, %s8162_s9   ;;  %s5359_s8 = sphi %s5455_s8, %s8161_s8   ;;  %s5355_s30 = sphi %s5453_s30, %s8160_s30   ;;  %s5351_s29 = sphi %s5451_s29, %s8159_s29   ;;  %s5347_s28 = sphi %s5449_s28, %s8158_s28   ;;  %s5343_s27 = sphi %s5447_s27, %s8157_s27   ;;  %s5339_s26 = sphi %s5445_s26, %s8156_s26   ;;  %s5335_s25 = sphi %s5443_s25, %s8155_s25   ;;  %s5331_s24 = sphi %s5441_s24, %s8154_s24  }
  0x16   : > { %7642 = sst [smem:[#allocation17_spill]] %s5371_s11  ;;  %s36_s16 = sadd.s32 1, %s5375_s12 }
  0x17   : > { %p37_p0 = scmp.ge.s32.totalorder %s36_s16, 2  ;;  %s39_s17 = sadd.s32 1, %s5379_s13 }
  0x18   : > { %p7369_p1 = scmp.eq.s32.totalorder %s5383_s14, 0  ;;  %p7370_p2 = scmp.eq.s32.totalorder %s5510_s15, 0 }
  0x19   : > { %s8168_s16 = smov (%p37_p0, %s36_s16), 0  ;;  %s8170_s17 = smov (!%p37_p0, %s39_s17), %s5379_s13 }
  0x1a   : > { %7643 = sst [smem:[#allocation18_spill]] %s8168_s16  ;;  %s44_s18 = ssub.s32 %s5375_s12, %s8168_s16 }
  0x1b   : > { %p41_p3 = scmp.ge.s32.totalorder %s8170_s17, 2  ;;  %s82_s19 = sadd.s32 1, %s5351_s29 }
  0x1c   : > { %p89_p4 = scmp.ne.s32.totalorder %s5351_s29, %s5347_s28  ;;  %p95_p6 = scmp.ne.s32.totalorder %s5347_s28, %s5343_s27 }
  0x1d   : > { %s8172_s17 = smov (%p41_p3, %s8170_s17), 0  ;;  %p7368_p10 = scmp.lt.s32.totalorder %s5383_s14, 4 }
  0x1e   : > { %7644 = sst [smem:[#allocation19_spill]] %s8172_s17  ;;  %s5526_s20 = ssub.s32 %s5379_s13, %s8172_s17 }
  0x1f   : > { %s5529_s21 = sor.u32 %s44_s18, %s5526_s20  ;;  %p5537_p7 = por %p89_p4, %p7369_p1 }
  0x20   : > { %p5543_p8 = por %p95_p6, %p7370_p2  ;;  %p7367_p9 = scmp.eq.s32.totalorder %s5526_s20, 0 }
  0x21   : > { %s311_s17 = sand.u32 1, %s5383_s14   ;;  %s313_s7 = sand.u32 1, %s5351_s29  }
  0x22   : > { %s7646_s23 = scalar_select %p5543_p8, 1, 0 }
  0x23   : > { %s5554_s16 = scalar_select %p7367_p9, %s5351_s29, %s82_s19  }
  0x24   : > { %7647 = sst [smem:[#allocation20_spill]] %s7646_s23  ;;  %s4299_s27 = sshll.u32 %s313_s7, 2 }
  0x25   : > { %7648 = sst [smem:[#allocation21_spill]] %s5554_s16  ;;  %s7366_s6 = sshll.u32 %s5379_s13, 7 }
  0x26   : > { %s7649_s1 = sld [smem:[#allocation125_spill]]  ;;  %s315_s10 = scalar_lea.vmem [#allocation5], %s4299_s27 }
  0x27   : > { %s327_s23 = sshll.u32 %s315_s10, 4  ;;  %p5571_p11 = pnand %p7368_p10, %p5537_p7  ;;  %s5565_s23 = int_to_ptr.vmem [resolvable:$true] %s327_s23 }
  0x28   : > { %s5575_s7 = scalar_lea.sflag [#allocation6], %s311_s17 }
  0x29   : > { %p5105_p13 = pneg %p5571_p11 }
  0x2c   : > { %s5563_s3 = scalar_lea.hbm %s7649_s1, %s7366_s6  ;;  %s5108_s22 = scalar_lea.hbm %s7649_s1, 256 }
  0x2d   : > { %s5103_s4 = scalar_lea.hbm %s5563_s3, 64  ;;  %p5109_p4 = scmp.lt.u32.totalorder %s5563_s3, %s7649_s1 }
  0x2e   : > { %p5104_p12 = scmp.ne.s32.totalorder %s5563_s3, %s5103_s4  ;;  %p5110_p6 = scmp.lt.u32.totalorder %s5108_s22, %s5103_s4 }
  0x2f   : > { %p5112_p9 = scmp.lt.u32.totalorder %s5103_s4, %s5563_s3 }
  0x30   : > { %p5106_p0 = pnand %p5105_p13, %p5104_p12  ;;  %p5111_p7 = por %p5110_p6, %p5109_p4 }
  0x32   : > { %p5107_p3 = pneg %p5106_p0  ;;  %p5113_p10 = por %p5112_p9, %p5111_p7 }
  0x34   : > { %p5114_p1 = pnand %p5113_p10, %p5107_p3 }
  0x36   : > { %5117 = shalt.err (!%p5114_p1)
}
  0x37   : > { %s5118_s17 = scalar_lea.vmem %s5565_s23, 64  ;;  %s5385_s10 = smov [#allocation5]  }
  0x38   : > { %p5119_p12 = scmp.ne.s32.totalorder %s5565_s23, %s5118_s17  ;;  %s5123_s11 = sshll.u32 %s5385_s10, 4  ;;  %s5124_s11 = int_to_ptr.vmem [resolvable:$false] %s5123_s11 }
  0x39   : > { %s5125_s6 = scalar_lea.vmem %s5124_s11, 128  ;;  %p5126_p2 = scmp.lt.s32.totalorder %s5565_s23, %s5124_s11 }
  0x3a   : > { %p5121_p0 = pnand %p5119_p12, %p5105_p13  ;;  %p5127_p4 = scmp.lt.s32.totalorder %s5125_s6, %s5118_s17 }
  0x3c   : > { %p5122_p5 = pneg %p5121_p0  ;;  %p5128_p6 = por %p5127_p4, %p5126_p2 }
  0x3e   : > { %p5129_p9 = pnand %p5128_p6, %p5122_p5 }
  0x40   : > { %5132 = shalt.err (!%p5129_p9)
}
  0x41   : > { %4964 = dma.hbm_to_vmem [thread:$0]  (!%p5571_p11), %s5563_s3, 64, %s5565_s23, %s5575_s7  }
  0x42   : > { %p4293_p1 = scmp.ge.s32.totalorder %s5383_s14, 1  ;;  %p259_p10 = scmp.lt.s32.totalorder %s5383_s14, 5 }
  0x43   : > { %s5386_s4 = smov [#allocation8]   ;;  %p7652_p5 = scmp.eq.s32.totalorder %s5510_s15, 0 }
  0x44   : > { %s277_s22 = sshll.u32 %s5386_s4, 4  ;;  %p5605_p13 = pnand %p4293_p1, %p259_p10  ;;  %s278_s22 = int_to_ptr.vmem [resolvable:$true] %s277_s22 }
  0x45   : > { %s4290_s17 = sadd.s32 4294967294, %s5383_s14   ;;  %s48_s3 = sadd.s32 1, %s5363_s9 }
  0x46   : > { %s7651_s27 = scalar_select %p5605_p13, 1, 0 }
  0x47   : > { %p4954_p2 = pneg %p5605_p13  ;;  %s7654_s5 = sld [smem:[#allocation128_spill]] }
  0x49   : > { %p5613_p3 = pnand %p4954_p2, %p7652_p5 }
  0x4b   : > { %p5135_p7 = pneg %p5613_p3 }
  0x4d   : > { %s5133_s11 = scalar_lea.hbm %s7654_s5, 8192 }
  0x4e   : > { %p5134_p11 = scmp.ne.s32.totalorder %s7654_s5, %s5133_s11  ;;  %p5140_p4 = scmp.lt.u32.totalorder %s5133_s11, %s7654_s5 }
  0x50   : > { %p5136_p12 = pnand %p5135_p7, %p5134_p11 }
  0x52   : > { %p5137_p0 = pneg %p5136_p12 }
  0x54   : > { %p5142_p6 = pnand %p5140_p4, %p5137_p0 }
  0x56   : > { %5145 = shalt.err (!%p5142_p6)
}
  0x57   : > { %s5146_s16 = scalar_lea.vmem %s278_s22, 8192  ;;  %p5154_p2 = scmp.lt.s32.totalorder %s278_s22, %s278_s22 }
  0x58   : > { %p5147_p9 = scmp.ne.s32.totalorder %s278_s22, %s5146_s16  ;;  %p5155_p5 = scmp.lt.s32.totalorder %s5146_s16, %s5146_s16 }
  0x5a   : > { %p5149_p1 = pnand %p5147_p9, %p5135_p7  ;;  %p5156_p8 = por %p5155_p5, %p5154_p2 }
  0x5c   : > { %p5150_p10 = pneg %p5149_p1 }
  0x5e   : > { %p5157_p13 = pnand %p5156_p8, %p5150_p10 }
  0x60   : > { %5160 = shalt.err (!%p5157_p13)
}
  0x61   : > { %s5387_s23 = smov 256   ;;  %s5388_s1 = smov 16  }
  0x62   : > { %4957 = dma.hbm_to_vmem [thread:$0]  (!%p5613_p3), %s7654_s5, 8192, %s278_s22, [#allocation9], %s5387_s23, %s5387_s23, %s5388_s1  }
  0x63   : > { %p7655_p8 = scmp.eq.s32.totalorder %s5529_s21, 0  ;;  %p55_p13 = scmp.ne.s32.totalorder %s5363_s9, %s5359_s8 }
  0x64   : > { %p61_p11 = scmp.ne.s32.totalorder %s5359_s8, %s5355_s30  ;;  %p246_p7 = scmp.eq.s32.totalorder %s5510_s15, 3 }
  0x65   : > { %s5638_s10 = scalar_select %p7655_p8, %s5363_s9, %s48_s3  }
  0x66   : > { %p252_p12 = scmp.eq.s32.totalorder %s4290_s17, 3  ;;  %p7657_p0 = scmp.eq.s32.totalorder %s5383_s14, 0 }
  0x67   : > { %7656 = sst [smem:[#allocation22_spill]] %s5638_s10  ;;  %p7658_p6 = scmp.eq.s32.totalorder %s5510_s15, 0 }
  0x68   : > { %p57_p4 = por %p7657_p0, %p55_p13  ;;  %p5653_p1 = por %p246_p7, %p55_p13 }
  0x69   : > { %p5649_p9 = por %p7658_p6, %p61_p11  ;;  %p5657_p3 = por %p252_p12, %p61_p11 }
  0x6a   : > { %s7660_s19 = scalar_select %p5653_p1, 1, 0 }
  0x6b   : > { %s7661_s21 = scalar_select %p5657_p3, 1, 0 }
  0x6c   : > { %s291_s22 = sand.u32 1, %s5363_s9   ;;  %s7662_s3 = sshll.u32 %s5379_s13, 1 }
  0x6d   : > { %s300_s6 = sadd.s32 %s5375_s12, %s7662_s3  ;;  %s4296_s4 = sshll.u32 %s291_s22, 2 }
  0x6e   : > { %s4298_s17 = sshll.u32 %s300_s6, 6  ;;  %s7663_s0 = sld [smem:[#allocation124_spill]] }
  0x6f   : > { %s295_s18 = scalar_lea.vmem [#allocation2], %s4296_s4  ;;  %p7664_p10 = scmp.lt.s32.totalorder %s5383_s14, 4 }
  0x70   : > { %s304_s5 = sshll.u32 %s295_s18, 4  ;;  %s292_s3 = scalar_lea.sflag [#allocation3], %s291_s22  ;;  %s5670_s5 = int_to_ptr.vmem [resolvable:$true] %s304_s5 }
  0x71   : > { %p5674_p2 = pnand %p7664_p10, %p57_p4 }
  0x73   : > { %p5163_p8 = pneg %p5674_p2 }
  0x74   : > { %s5668_s16 = scalar_lea.hbm %s7663_s0, %s4298_s17  ;;  %s5166_s23 = scalar_lea.hbm %s7663_s0, 256 }
  0x75   : > { %s5161_s6 = scalar_lea.hbm %s5668_s16, 64  ;;  %p5167_p7 = scmp.lt.u32.totalorder %s5668_s16, %s7663_s0 }
  0x76   : > { %p5162_p5 = scmp.ne.s32.totalorder %s5668_s16, %s5161_s6  ;;  %p5168_p12 = scmp.lt.u32.totalorder %s5166_s23, %s5161_s6 }
  0x77   : > { %p5170_p4 = scmp.lt.u32.totalorder %s5161_s6, %s5668_s16 }
  0x78   : > { %p5164_p13 = pnand %p5163_p8, %p5162_p5  ;;  %p5169_p0 = por %p5168_p12, %p5167_p7 }
  0x7a   : > { %p5165_p11 = pneg %p5164_p13  ;;  %p5171_p6 = por %p5170_p4, %p5169_p0 }
  0x7c   : > { %p5172_p10 = pnand %p5171_p6, %p5165_p11 }
  0x7e   : > { %5175 = shalt.err (!%p5172_p10)
}
  0x7f   : > { %s5176_s22 = scalar_lea.vmem %s5670_s5, 64  ;;  %s5389_s4 = smov [#allocation2]  }
  0x80   : > { %p5177_p5 = scmp.ne.s32.totalorder %s5670_s5, %s5176_s22  ;;  %s5181_s17 = sshll.u32 %s5389_s4, 4  ;;  %s5182_s17 = int_to_ptr.vmem [resolvable:$false] %s5181_s17 }
  0x81   : > { %s5183_s1 = scalar_lea.vmem %s5182_s17, 128  ;;  %p5184_p1 = scmp.lt.s32.totalorder %s5670_s5, %s5182_s17 }
  0x82   : > { %p5179_p13 = pnand %p5177_p5, %p5163_p8  ;;  %p5185_p7 = scmp.lt.s32.totalorder %s5183_s1, %s5176_s22 }
  0x84   : > { %p5180_p3 = pneg %p5179_p13  ;;  %p5186_p12 = por %p5185_p7, %p5184_p1 }
  0x86   : > { %p5187_p0 = pnand %p5186_p12, %p5180_p3 }
  0x88   : > { %5190 = shalt.err (!%p5187_p0)
}
  0x89   : > { %4961 = dma.hbm_to_vmem [thread:$0]  (!%p5674_p2), %s5668_s16, 64, %s5670_s5, %s292_s3  }
  0x8a   : > { %s116_s6 = sadd.s32 1, %s5339_s26  ;;  %p123_p1 = scmp.ne.s32.totalorder %s5339_s26, %s5335_s25 }
  0x8b   : > { %p129_p3 = scmp.ne.s32.totalorder %s5335_s25, %s5331_s24  ;;  %s336_s23 = sand.u32 1, %s5339_s26  }
  0x8c   : > { %p7666_p8 = scmp.eq.s32.totalorder %s5383_s14, 0  ;;  %p7667_p4 = scmp.eq.s32.totalorder %s5510_s15, 0 }
  0x8d   : > { %s4303_s18 = sshll.u32 %s336_s23, 2  ;;  %s7669_s22 = sshll.u32 %s5379_s13, 7 }
  0x8e   : > { %p125_p11 = por %p123_p1, %p7666_p8  ;;  %p5713_p6 = por %p129_p3, %p7667_p4 }
  0x8f   : > { %s5327_s4 = sadd.s32 64, %s7669_s22  ;;  %s338_s17 = scalar_lea.vmem [#allocation7], %s4303_s18 }
  0x90   : > { %s7668_s10 = scalar_select %p5713_p6, 1, 0 }
  0x91   : > { %s350_s1 = sshll.u32 %s338_s17, 4  ;;  %p7670_p10 = scmp.eq.s32.totalorder %s5526_s20, 0  ;;  %s5729_s1 = int_to_ptr.vmem [resolvable:$true] %s350_s1 }
  0x92   : > { %s5727_s24 = scalar_lea.hbm %s7352_s2, %s5327_s4  ;;  %p7671_p2 = scmp.lt.s32.totalorder %s5383_s14, 4 }
  0x93   : > { %s5722_s0 = scalar_select %p7670_p10, %s5339_s26, %s116_s6  }
  0x94   : > { %p5733_p5 = pnand %p7671_p2, %p125_p11  ;;  %s5191_s20 = scalar_lea.hbm %s5727_s24, 64 }
  0x95   : > { %p5192_p13 = scmp.ne.s32.totalorder %s5727_s24, %s5191_s20  ;;  %s5196_s18 = scalar_lea.hbm %s7352_s2, 256 }
  0x96   : > { %p5193_p7 = pneg %p5733_p5  ;;  %p5197_p1 = scmp.lt.u32.totalorder %s5727_s24, %s7352_s2 }
  0x97   : > { %p5198_p3 = scmp.lt.u32.totalorder %s5196_s18, %s5191_s20  ;;  %p5200_p11 = scmp.lt.u32.totalorder %s5191_s20, %s5727_s24 }
  0x98   : > { %p5194_p12 = pnand %p5193_p7, %p5192_p13 }
  0x99   : > { %p5199_p8 = por %p5198_p3, %p5197_p1 }
  0x9a   : > { %p5195_p0 = pneg %p5194_p12 }
  0x9b   : > { %p5201_p4 = por %p5200_p11, %p5199_p8 }
  0x9d   : > { %p5202_p10 = pnand %p5201_p4, %p5195_p0 }
  0x9f   : > { %5205 = shalt.err (!%p5202_p10)
}
  0xa0   : > { %s5206_s17 = scalar_lea.vmem %s5729_s1, 64  ;;  %s5390_s5 = smov [#allocation7]  }
  0xa1   : > { %p5207_p2 = scmp.ne.s32.totalorder %s5729_s1, %s5206_s17  ;;  %s5211_s16 = sshll.u32 %s5390_s5, 4  ;;  %s5212_s16 = int_to_ptr.vmem [resolvable:$false] %s5211_s16 }
  0xa2   : > { %s5213_s6 = scalar_lea.vmem %s5212_s16, 128  ;;  %p5214_p6 = scmp.lt.s32.totalorder %s5729_s1, %s5212_s16 }
  0xa3   : > { %p5209_p13 = pnand %p5207_p2, %p5193_p7  ;;  %p5215_p1 = scmp.lt.s32.totalorder %s5213_s6, %s5206_s17 }
  0xa5   : > { %p5210_p12 = pneg %p5209_p13  ;;  %p5216_p3 = por %p5215_p1, %p5214_p6 }
  0xa7   : > { %p5217_p8 = pnand %p5216_p3, %p5210_p12 }
  0xa9   : > { %5220 = shalt.err (!%p5217_p8)
}
  0xaa   : > { %4967 = dma.hbm_to_vmem [thread:$0]  (!%p5733_p5), %s5727_s24, 64, %s5729_s1, %s5575_s7  }
  0xab   : > { %p7673_p0 = scmp.ne.s32.totalorder %s7651_s27, 0 }
  0xad   : > { %372 = sbr.rel (%p7673_p0) target bundleno = 1057 (0x421), region = 48 }
  0xb4   : > { %s5766_s20 = sand.u32 1, %s5359_s8  }
  0xb5   : > { %s4307_s23 = sshll.u32 %s5766_s20, 2  ;;  %s375_s18 = scalar_lea.sflag [#allocation3], %s5766_s20 }
  0xb6   : > { %s378_s22 = scalar_lea.vmem [#allocation2], %s4307_s23 }
  0xb7   : > { %5306 = dma.done.wait (%p5649_p9), %s375_s18, 64  }
  0xb8   : > { %5308 = vsyncadd (%p5649_p9), %s375_s18, 4294967232  ;;  %s7674_s7 = sld [smem:[#allocation20_spill]]  ;;  %s383_s1 = sand.u32 1, %s5510_s15  }
  0xb9   : > { %s385_s27 = sand.u32 1, %s5347_s28   ;;  %s384_s3 = scalar_lea.sflag [#allocation6], %s383_s1 }
  0xba   : > { %s4308_s24 = sshll.u32 %s385_s27, 2 }
  0xbb   : > { %s387_s4 = scalar_lea.vmem [#allocation5], %s4308_s24 }
  0xbe   : > { %p7675_p6 = scmp.ne.s32.totalorder %s7674_s7, 0 }
  0xc0   : > { %5310 = dma.done.wait (%p7675_p6), %s384_s3, 64  }
  0xc1   : > { %5312 = vsyncadd (%p7675_p6), %s384_s3, 4294967232  ;;  %s394_s17 = sand.u32 1, %s5335_s25   ;;  %p7676_p5 = scmp.ne.s32.totalorder %s7668_s10, 0 }
  0xc2   : > { %s4309_s5 = sshll.u32 %s394_s17, 2 }
  0xc3   : > { %s396_s16 = scalar_lea.vmem [#allocation7], %s4309_s5 }
  0xc4   : > { %5314 = dma.done.wait (%p7676_p5), %s384_s3, 64  }
  0xc5   : > { %5316 = vsyncadd (%p7676_p5), %s384_s3, 4294967232  ;;  %p7677_p9 = scmp.eq.s32.totalorder %s5510_s15, 0 }
  0xc7   : > { %5318 = dma.done.wait (%p7677_p9), [#allocation9], 8192   ;;  %p7678_p7 = pmov %p7677_p9 }
  0xc8   : > { %s7679_s11 = sld [smem:[#allocation16_spill]]  ;;  %v5391_v0 = vmov 127   ;;  %v5392_v1 = vmov 0   ;;  %v468_v4 = vld [vmem:[%s387_s4] sm:$0xf]  ;;  %s5393_s15 = smov 1  }
  0xc9   : > { %5320 = vsyncadd (%p7678_p7), [#allocation9], 4294959104  ;;  %5100 = vset.pattern.permute.xlu0 %v5391_v0  ;;  %5102 = vset.pattern.permute.xlu1 %v5392_v1  ;;  %v5791_v5 = vld [vmem:[%s378_s22] sm:$0xf]  ;;  %v469_v7 = vld [vmem:[%s396_s16] sm:$0xf] }
  0xca   : > { %483 = vrot.lane.b32.xlu1 %v5791_v5, %s5393_s15  ;;  %s5394_s10 = smov 127   ;;  %v7395_v9 = vmov 0.0   ;;  %vm5396_vm2 = vmmov 0   ;;  %v5801_v10 = vld [vmem:[#allocation8 + $0x8] sm:$0xff]  ;;  %v5803_v11 = vld [vmem:[#allocation8 + $0x18] sm:$0xff]  ;;  %v5805_v12 = vld [vmem:[#allocation8] sm:$0xff] }
  0xcb   : > { %4372 = vmatprep.subr.mxu0 %v7395_v9  ;;  %4374 = vmatprep.mubr.msk.f32.mxu0 %vm5396_vm2, %v7395_v9  ;;  %v7394_v13 = vand.u32 4294901760, %v5801_v10  ;;  %v7393_v14 = vand.u32 4294901760, %v5803_v11  ;;  %v5809_v15 = vld [vmem:[#allocation8 + $0x10] sm:$0xff]  ;;  %v7389_v16 = vand.u32 4294901760, %v5805_v12  ;;  %v5812_v17 = vld [vmem:[#allocation8 + $0x28] sm:$0xff]  ;;  %v5814_v18 = vld [vmem:[#allocation8 + $0x38] sm:$0xff] }
  0xcc   : > { %4432 = vmatprep.subr.mxu1 %v7395_v9  ;;  %4434 = vmatprep.mubr.msk.f32.mxu1 %vm5396_vm2, %v7395_v9  ;;  %v7388_v19 = vand.u32 4294901760, %v5809_v15  ;;  %v7386_v20 = vand.u32 4294901760, %v5812_v17  ;;  %v5818_v21 = vld [vmem:[#allocation8 + $0x108] sm:$0xff]  ;;  %v5820_v22 = vld [vmem:[#allocation8 + $0x118] sm:$0xff]  ;;  %v5822_v23 = vld [vmem:[#allocation8 + $0x20] sm:$0xff]  ;;  %v7384_v27 = vand.u32 4294901760, %v5814_v18 }
  0xcd   : > { %v5827_v24 = vsub.f32 %v5801_v10, %v7394_v13  ;;  %v5832_v25 = vsub.f32 %v5803_v11, %v7393_v14  ;;  %v5837_v26 = vsub.f32 %v5805_v12, %v7389_v16  ;;  %v5840_v28 = vld [vmem:[#allocation8 + $0x30] sm:$0xff]  ;;  %v5842_v29 = vld [vmem:[#allocation8 + $0x100] sm:$0xff]  ;;  %vm507_vm3 = vcmask 31744   ;;  %v5856_v33 = vld [vmem:[#allocation8 + $0x48] sm:$0xff]  ;;  %s7686_s7 = sld [smem:[#allocation126_spill]]  ;;  %s8144_s17 = sld [smem:[#allocation129_spill]] }
  0xce   : > { %p470_p11 = scmp.gt.s32.totalorder %s7679_s11, 0  ;;  %p475_p4 = scmp.lt.s32.totalorder %s7679_s11, 1  ;;  %492 = vrot.lane.b32.xlu1 %v5791_v5, %s5394_s10  ;;  %v5844_v30 = vld [vmem:[#allocation8 + $0x110] sm:$0xff]  ;;  %v5849_v31 = vsub.f32 %v5809_v15, %v7388_v19  ;;  %v5854_v32 = vsub.f32 %v5812_v17, %v7386_v20  ;;  %v5861_v34 = vsub.f32 %v5814_v18, %v7384_v27  ;;  %v7392_v35 = vand.u32 4294901760, %v5818_v21  ;;  %v5872_v42 = vld [vmem:[#allocation8 + $0x58] sm:$0xff]  ;;  %v5874_v43 = vld [vmem:[#allocation8 + $0x128] sm:$0xff] }
  0xcf   : > { %7680 = vst [vmem:[#allocation23_spill] sm:$0xff] %v5827_v24  ;;  %7681 = vst [vmem:[#allocation24_spill] sm:$0xff] %v5832_v25  ;;  %v7391_v36 = vand.u32 4294901760, %v5820_v22  ;;  %v7383_v37 = vand.u32 4294901760, %v5822_v23  ;;  %v7382_v39 = vand.u32 4294901760, %v5840_v28  ;;  %v7381_v40 = vand.u32 4294901760, %v5842_v29 }
  0xd0   : > { %s471_s6 = scalar_select %p470_p11, 1, 0  ;;  %7682 = vst [vmem:[#allocation25_spill] sm:$0xff] %v5837_v26  ;;  %7683 = vst [vmem:[#allocation26_spill] sm:$0xff] %v5849_v31  ;;  %v7378_v41 = vand.u32 4294901760, %v5844_v30  ;;  %v5879_v44 = vsub.f32 %v5818_v21, %v7392_v35  ;;  %v7377_v47 = vand.u32 4294901760, %v5856_v33 }
  0xd1   : > { %s476_s23 = scalar_select %p475_p4, 1, 0  ;;  %7684 = vst [vmem:[#allocation27_spill] sm:$0xff] %v5854_v32  ;;  %7685 = vst [vmem:[#allocation28_spill] sm:$0xff] %v5861_v34  ;;  %v5884_v45 = vsub.f32 %v5820_v22, %v7391_v36  ;;  %v5889_v46 = vsub.f32 %v5822_v23, %v7383_v37  ;;  %v5892_v48 = vld [vmem:[#allocation8 + $0x138] sm:$0xff]  ;;  %v5894_v49 = vld [vmem:[#allocation8 + $0x40] sm:$0xff]  ;;  %v5901_v51 = vsub.f32 %v5840_v28, %v7382_v39 }
  0xd2   : > { %v472_v2 = vstv %s471_s6  ;;  %7687 = vst [vmem:[#allocation29_spill] sm:$0xff] %v5879_v44  ;;  %v5896_v50 = vld [vmem:[#allocation8 + $0x50] sm:$0xff]  ;;  %v5906_v52 = vsub.f32 %v5842_v29, %v7381_v40  ;;  %v5908_v53 = vld [vmem:[#allocation8 + $0x120] sm:$0xff]  ;;  %v5915_v55 = vsub.f32 %v5844_v30, %v7378_v41  ;;  %v7376_v56 = vand.u32 4294901760, %v5872_v42  ;;  %v6005_v13 = vld [vmem:[#allocation8 + $0x88] sm:$0xff]  ;;  %s7953_s6 = sld [smem:[#allocation127_spill]] }
  0xd3   : > { %vm473_vm0 = vcmp.eq.s32.totalorder %v472_v2, 1  ;;  %v477_v3 = vstv %s476_s23  ;;  %v4317_v38 = vld [vmem:[%s7686_s7 + $0x18] sm:$0xff]  ;;  %7688 = vst [vmem:[#allocation30_spill] sm:$0xff] %v5884_v45  ;;  %7689 = vst [vmem:[#allocation31_spill] sm:$0xff] %v5889_v46  ;;  %v5910_v54 = vld [vmem:[#allocation8 + $0x130] sm:$0xff]  ;;  %v5921_v57 = vsub.f32 %v5856_v33, %v7377_v47  ;;  %v7375_v58 = vand.u32 4294901760, %v5874_v43 }
  0xd4   : > { %v474_v6 = vsel %vm473_vm0, %v468_v4, 0.0  ;;  %vm478_vm1 = vcmp.eq.s32.totalorder %v477_v3, 1  ;;  %7690 = vst [vmem:[#allocation32_spill] sm:$0xff] %v5901_v51  ;;  %7691 = vst [vmem:[#allocation33_spill] sm:$0xff] %v5906_v52  ;;  %v509_v59 = vsel %vm507_vm3, %v4317_v38, 0  ;;  %v500_v60 = vld [vmem:[%s7686_s7] sm:$0xff]  ;;  %v5934_v0 = vsub.f32 %v5872_v42, %v7376_v56 }
  0xd5   : > { %487 = vperm.xlu0 %5100, %v474_v6   ;;  %v479_v8 = vsel %vm478_vm1, %v469_v7, 0.0  ;;  %7692 = vst [vmem:[#allocation34_spill] sm:$0xff] %v5915_v55  ;;  %7693 = vst [vmem:[#allocation35_spill] sm:$0xff] %v5921_v57  ;;  %v7379_v61 = vand.u32 4294901760, %v5892_v48  ;;  %v7380_v62 = vand.u32 4294901760, %v5894_v49  ;;  %v7385_v63 = vand.u32 4294901760, %v5896_v50 }
  0xd6   : > { %7694 = vst [vmem:[#allocation36_spill] sm:$0xff] %v5934_v0  ;;  %v7387_v2 = vand.u32 4294901760, %v5908_v53  ;;  %v7390_v3 = vand.u32 4294901760, %v5910_v54  ;;  %v5943_v4 = vld [vmem:[#allocation8 + $0x68] sm:$0xff]  ;;  %v5945_v6 = vld [vmem:[#allocation8 + $0x78] sm:$0xff]  ;;  %v5961_v56 = vld [vmem:[#allocation8 + $0x60] sm:$0xff] }
  0xd7   : > { %v5947_v7 = vld [vmem:[#allocation8 + $0x148] sm:$0xff]  ;;  %v5957_v38 = vsub.f32 %v5894_v49, %v7380_v62  ;;  %v5963_v47 = vld [vmem:[#allocation8 + $0x70] sm:$0xff]  ;;  %v5968_v41 = vsub.f32 %v5896_v50, %v7385_v63  ;;  %v5980_v40 = vld [vmem:[#allocation8 + $0x140] sm:$0xff]  ;;  %v5984_v37 = vand.u32 4294901760, %v509_v59  ;;  %v1414_v27 = vsel %vm507_vm3, %v500_v60, 0  ;;  %s8137_s23 = sld [smem:[#allocation17_spill]] }
  0xd8   : > { %v5978_v62 = vsub.f32 %v5910_v54, %v7390_v3  ;;  %v5982_v39 = vld [vmem:[#allocation8 + $0x150] sm:$0xff]  ;;  %v7397_v63 = vand.u32 4294901760, %v5943_v4  ;;  %v7398_v20 = vand.u32 4294901760, %v5945_v6  ;;  %v6007_v9 = vld [vmem:[#allocation8 + $0x98] sm:$0xff]  ;;  %v6009_v16 = vld [vmem:[#allocation8 + $0x168] sm:$0xff]  ;;  %v7705_v35 = vand.u32 4294901760, %v5961_v56 }
  0xd9   : > { %5101 = vset.pattern.permute.xlu0 %v5392_v1  ;;  %v5939_v1 = vsub.f32 %v5874_v43, %v7375_v58  ;;  %7697 = vst [vmem:[#allocation39_spill] sm:$0xff] %v5957_v38  ;;  %v5959_v58 = vld [vmem:[#allocation8 + $0x158] sm:$0xff]  ;;  %7698 = vst [vmem:[#allocation40_spill] sm:$0xff] %v5968_v41  ;;  %v6049_v41 = vld [vmem:[#allocation8 + $0x170] sm:$0xff]  ;;  %v6052_v38 = vsub.f32 %v509_v59, %v5984_v37  ;;  %vm511_vm5 = vcmask 1043456   ;;  %s4312_s15 = sshll.u32 %s7679_s11, 1 }
  0xda   : > { %496 = vperm.xlu0 %5101, %v479_v8   ;;  %v5952_v8 = vsub.f32 %v5892_v48, %v7379_v61  ;;  %v5973_v61 = vsub.f32 %v5908_v53, %v7387_v2  ;;  %7700 = vst [vmem:[#allocation42_spill] sm:$0xff] %v5978_v62  ;;  %v7402_v2 = vand.u32 4294901760, %v5947_v7  ;;  %v7404_v19 = vand.u32 4294901760, %v5959_v58  ;;  %v6026_v3 = vld [vmem:[#allocation8 + $0x178] sm:$0xff]  ;;  %v6074_v57 = vld [vmem:[#allocation8 + $0xa8] sm:$0xff]  ;;  %v6115_v51 = vld [vmem:[#allocation8 + $0xb0] sm:$0xff] }
  0xdb   : > { %7695 = vst [vmem:[#allocation37_spill] sm:$0xff] %v5939_v1  ;;  %v5996_v36 = vsub.f32 %v5943_v4, %v7397_v63  ;;  %v6001_v60 = vsub.f32 %v5945_v6, %v7398_v20  ;;  %v6024_v14 = vsub.f32 %v5961_v56, %v7705_v35  ;;  %v480_v62 = vlaneseq  ;;  %p459_p2 = scmp.lt.s32.totalorder %s4312_s15, 3  ;;  %s4311_s10 = sshll.u32 %s5766_s20, 5 }
  0xdc   : > { %7696 = vst [vmem:[#allocation38_spill] sm:$0xff] %v5952_v8  ;;  %7699 = vst [vmem:[#allocation41_spill] sm:$0xff] %v5973_v61  ;;  %v6014_v63 = vsub.f32 %v5947_v7, %v7402_v2  ;;  %v6019_v20 = vsub.f32 %v5959_v58, %v7404_v19  ;;  %v7707_v2 = vand.u32 4294901760, %v5963_v47  ;;  %v7709_v19 = vand.u32 4294901760, %v5980_v40  ;;  %v6047_v61 = vld [vmem:[#allocation8 + $0x160] sm:$0xff]  ;;  %s449_s16 = scalar_lea.vmem [#allocation10], %s4311_s10 }
  0xdd   : > { %7701 = vst [vmem:[#allocation43_spill] sm:$0xff] %v5996_v36  ;;  %7702 = vst [vmem:[#allocation44_spill] sm:$0xff] %v6001_v60  ;;  %v6028_v60 = vld [vmem:[#allocation8 + $0x80] sm:$0xff]  ;;  %v6030_v36 = vld [vmem:[#allocation8 + $0x90] sm:$0xff]  ;;  %v7711_v35 = vand.u32 4294901760, %v5982_v39  ;;  %v6054_v8 = vand.u32 4294901760, %v1414_v27 }
  0xde   : > { %7703 = vst [vmem:[#allocation45_spill] sm:$0xff] %v6014_v63  ;;  %7704 = vst [vmem:[#allocation46_spill] sm:$0xff] %v6019_v20  ;;  %v6035_v63 = vsub.f32 %v5963_v47, %v7707_v2  ;;  %v6040_v20 = vsub.f32 %v5980_v40, %v7709_v19  ;;  %v7418_v2 = vand.u32 4294901760, %v6005_v13  ;;  %v6093_v19 = vld [vmem:[#allocation8 + $0x188] sm:$0xff]  ;;  %v7434_v52 = vand.u32 4294901760, %v6074_v57  ;;  %p457_p10 = scmp.lt.s32.totalorder %s8137_s23, 1 }
  0xdf   : > { %7706 = vst [vmem:[#allocation47_spill] sm:$0xff] %v6024_v14  ;;  %v6045_v14 = vsub.f32 %v5982_v39, %v7711_v35  ;;  %v481_v35 = vand.u32 127, %v480_v62  ;;  %v6097_v62 = vld [vmem:[#allocation8 + $0xa0] sm:$0xff]  ;;  %v6118_v46 = vsub.f32 %v1414_v27, %v6054_v8  ;;  %s460_s22 = scalar_select %p459_p2, %s4312_s15, 3 }
  0xe0   : > { %7708 = vst [vmem:[#allocation48_spill] sm:$0xff] %v6035_v63  ;;  %7710 = vst [vmem:[#allocation49_spill] sm:$0xff] %v6040_v20  ;;  %v7420_v63 = vand.u32 4294901760, %v6007_v9  ;;  %v6065_v1 = vsub.f32 %v6005_v13, %v7418_v2  ;;  %v6076_v20 = vld [vmem:[#allocation8 + $0xb8] sm:$0xff]  ;;  %v7717_v2 = vand.u32 4294901760, %v6026_v3  ;;  %s458_s18 = scalar_select %p457_p10, %s8137_s23, 1 }
  0xe1   : > { %7712 = vst [vmem:[#allocation50_spill] sm:$0xff] %v6045_v14  ;;  %v7715_v14 = vand.u32 4294901760, %v6009_v16  ;;  %vm482_vm4 = vcmp.eq.s32.totalorder %v481_v35, 0  ;;  %vm491_vm6 = vcmp.eq.s32.totalorder %v481_v35, 127  ;;  %s4320_s11 = sshll.u32 %s8137_s23, 3  ;;  %s8145_s10 = sld [smem:[#allocation130_spill]] }
  0xe2   : > { %7713 = vst [vmem:[#allocation51_spill] sm:$0xff] %v6065_v1  ;;  %v6070_v59 = vsub.f32 %v6007_v9, %v7420_v63  ;;  %v6086_v1 = vsub.f32 %v6026_v3, %v7717_v2  ;;  %v7719_v63 = vand.u32 4294901760, %v6028_v60  ;;  %v7723_v2 = vand.u32 4294901760, %v6047_v61  ;;  %s4313_s1 = sshll.u32 %s458_s18, 2  ;;  %s4125_s18 = sshll.u32 %s449_s16, 4  ;;  %s7267_s18 = int_to_ptr.vmem [resolvable:$true] %s4125_s18 }
  0xe3   : > { %v6081_v55 = vsub.f32 %v6009_v16, %v7715_v14  ;;  %v7721_v14 = vand.u32 4294901760, %v6030_v36  ;;  %s462_s27 = sadd.s32 %s4313_s1, %s460_s22  ;;  %s5221_s3 = scalar_lea.vmem %s7267_s18, 512 }
  0xe4   : > { %7714 = vst [vmem:[#allocation52_spill] sm:$0xff] %v6070_v59  ;;  %7718 = vst [vmem:[#allocation54_spill] sm:$0xff] %v6086_v1  ;;  %v6091_v0 = vsub.f32 %v6028_v60, %v7719_v63  ;;  %v6095_v59 = vld [vmem:[#allocation8 + $0x198] sm:$0xff]  ;;  %v6108_v1 = vsub.f32 %v6047_v61, %v7723_v2  ;;  %v7725_v63 = vand.u32 4294901760, %v6049_v41  ;;  %v7730_v2 = vand.u32 4294901760, %v6093_v19  ;;  %s4314_s24 = sshll.u32 %s462_s27, 3  ;;  %p5222_p13 = scmp.ne.s32.totalorder %s7267_s18, %s5221_s3 }
  0xe5   : > { %7716 = vst [vmem:[#allocation53_spill] sm:$0xff] %v6081_v55  ;;  %v6103_v55 = vsub.f32 %v6030_v36, %v7721_v14  ;;  %v7436_v14 = vand.u32 4294901760, %v6076_v20  ;;  %v7732_v34 = vand.u32 4294901760, %v6095_v59  ;;  %s464_s5 = scalar_lea.vmem %s8144_s17, %s4314_s24  ;;  %s4110_s24 = scalar_lea.sflag [#allocation4], %s5766_s20 }
  0xe6   : > { %7720 = vst [vmem:[#allocation55_spill] sm:$0xff] %v6091_v0  ;;  %7724 = vst [vmem:[#allocation57_spill] sm:$0xff] %v6108_v1  ;;  %v6113_v0 = vsub.f32 %v6049_v41, %v7725_v63  ;;  %v6128_v63 = vsub.f32 %v6074_v57, %v7434_v52  ;;  %v6142_v44 = vsub.f32 %v6093_v19, %v7730_v2  ;;  %p8147_p12 = scmp.ne.s32.totalorder %s7660_s19, 0  ;;  %s5397_s4 = smov [#allocation10]  }
  0xe7   : > { %7722 = vst [vmem:[#allocation56_spill] sm:$0xff] %v6103_v55  ;;  %v6133_v27 = vsub.f32 %v6076_v20, %v7436_v14  ;;  %v7729_v55 = vand.u32 4294901760, %v6052_v38  ;;  %v6147_v52 = vsub.f32 %v6095_v59, %v7732_v34  ;;  %s8146_s1 = smov %s8145_s10  ;;  %s5225_s17 = sshll.u32 %s5397_s4, 4  ;;  %s5226_s17 = int_to_ptr.vmem [resolvable:$false] %s5225_s17 }
  0xe8   : > { %7726 = vst [vmem:[#allocation58_spill] sm:$0xff] %v6113_v0  ;;  %7727 = vst [vmem:[#allocation59_spill] sm:$0xff] %v6128_v63  ;;  %v7734_v63 = vand.u32 4294901760, %v6097_v62  ;;  %v1487_v0 = vand.u32 4294901760, %v6118_v46  ;;  %p5223_p1 = pnand %p5222_p13, %p8147_p12  ;;  %p5228_p8 = scmp.lt.s32.totalorder %s7267_s18, %s5226_s17 }
  0xe9   : > { %7728 = vst [vmem:[#allocation60_spill] sm:$0xff] %v6133_v27  ;;  %v584_v45 = vsub.f32 %v6052_v38, %v7729_v55  ;;  %7731 = vst [vmem:[#allocation61_spill] sm:$0xff] %v6142_v44  ;;  %v7736_v55 = vand.u32 4294901760, %v6115_v51 }
  0xea   : > { %7733 = vst [vmem:[#allocation62_spill] sm:$0xff] %v6147_v52  ;;  %v6152_v14 = vsub.f32 %v6097_v62, %v7734_v63  ;;  %v1488_v63 = vsub.f32 %v6118_v46, %v1487_v0  ;;  %p5224_p3 = pneg %p5223_p1 }
  0xeb   : > { %v6158_v27 = vsub.f32 %v6115_v51, %v7736_v55  ;;  %v585_v31 = vand.u32 4294901760, %v584_v45  ;;  %v7738_v55 = vmov 0.0  }
  0xec   : > { %7735 = vst [vmem:[#allocation63_spill] sm:$0xff] %v6152_v14 }
  0xed   : > { %7737 = vst [vmem:[#allocation64_spill] sm:$0xff] %v6158_v27 }
 0x13c   : > { %v484_v1 = vpop.permute.xlu1 %483 }
 0x140   : > { %v493_v52 = vpop.permute.xlu1 %492 }
 0x154   : > { %v488_v2 = vpop.permute.xlu0 %487 }
 0x155   : > { %v490_v44 = vsel %vm482_vm4, %v488_v2, %v484_v1 }
 0x156   : > { %v513_v32 = vsel %vm511_vm5, %v490_v44, 0  ;;  %v1489_v44 = vand.u32 4294901760, %v1488_v63  ;;  %v4316_v63 = vld [vmem:[%s7686_s7 + $0x10] sm:$0xff] }
 0x157   : > { %v6161_v34 = vand.u32 4294901760, %v513_v32 }
 0x159   : > { %v593_v14 = vsub.f32 %v513_v32, %v6161_v34  ;;  %v497_v26 = vpop.permute.xlu0 %496  ;;  %4373 = vmatpush3.msra.mxu0 %v6161_v34 }
 0x15a   : > { %v499_v25 = vsel %vm491_vm6, %v497_v26, %v493_v52  ;;  %4375 = vmatmul.mubr.f32.vlgmr.msra.gmra.mrb[0].mxu0 %v585_v31  ;;  %4377 = vmatprep.subr.mxu0 %v7738_v55  ;;  %v4315_v31 = vld [vmem:[%s7686_s7 + $0x8] sm:$0xff]  ;;  %v7739_v52 = vand.u32 4294901760, %v6052_v38 }
 0x15b   : > { %v594_v27 = vand.u32 4294901760, %v593_v14  ;;  %v1417_v1 = vsel %vm511_vm5, %v499_v25, 0  ;;  %4379 = vmatprep.mubr.msk.f32.mxu0 %vm5396_vm2, %v7738_v55 }
 0x15c   : > { %v1420_v45 = vand.u32 4294901760, %v1417_v1 }
 0x15d   : > { %v595_v35 = vsub.f32 %v593_v14, %v594_v27 }
 0x15e   : > { %v1497_v2 = vsub.f32 %v1417_v1, %v1420_v45  ;;  %4433 = vmatpush3.msra.mxu1 %v1420_v45 }
 0x15f   : > { %4435 = vmatmul.mubr.f32.vlgmr.msra.gmra.mrb[0].mxu1 %v1489_v44  ;;  %v596_v32 = vand.u32 4294901760, %v595_v35  ;;  %4437 = vmatprep.subr.mxu1 %v7738_v55 }
 0x160   : > { %v1498_v24 = vand.u32 4294901760, %v1497_v2  ;;  %4439 = vmatprep.mubr.msk.f32.mxu1 %vm5396_vm2, %v7738_v55 }
 0x161   : > { %4378 = vmatpush3.msra.mxu0 %v596_v32 }
 0x162   : > { %4380 = vmatmul.mubr.f32.vlgmr.msra.gmra.mrb[0].mxu0 %v5984_v37  ;;  %4382 = vmatprep.subr.mxu0 %v7738_v55  ;;  %v1499_v25 = vsub.f32 %v1497_v2, %v1498_v24 }
 0x163   : > { %4383 = vmatpush3.msra.mxu0 %v593_v14  ;;  %4384 = vmatprep.mubr.msk.f32.mxu0 %vm5396_vm2, %v7738_v55  ;;  %v962_v14 = vsel %vm507_vm3, %v4315_v31, 0 }
 0x164   : > { %v1500_v26 = vand.u32 4294901760, %v1499_v25  ;;  %4387 = vmatprep.subr.mxu0 %v7738_v55  ;;  %v6206_v1 = vand.u32 4294901760, %v962_v14 }
 0x166   : > { %4438 = vmatpush3.msra.mxu1 %v1500_v26 }
 0x167   : > { %4440 = vmatmul.mubr.f32.vlgmr.msra.gmra.mrb[0].mxu1 %v6054_v8  ;;  %4442 = vmatprep.subr.mxu1 %v7738_v55 }
 0x168   : > { %4443 = vmatpush3.msra.mxu1 %v1497_v2  ;;  %4444 = vmatprep.mubr.msk.f32.mxu1 %vm5396_vm2, %v7738_v55 }
 0x169   : > { %4447 = vmatprep.subr.mxu1 %v7738_v55 }
 0x16a   : > { %4385 = vmatmul.mubr.f32.vlgmr.msra.gmra.mrb[0].mxu0 %v6052_v38  ;;  %v1866_v38 = vsel %vm507_vm3, %v4316_v63, 0  ;;  %v7744_v63 = vand.u32 4294901760, %v5820_v22 }
 0x16b   : > { %4388 = vmatpush3.msra.mxu0 %v6161_v34  ;;  %4389 = vmatprep.mubr.msk.f32.mxu0 %vm5396_vm2, %v7738_v55 }
 0x16c   : > { %4392 = vmatprep.subr.mxu0 %v7738_v55 }
 0x16f   : > { %4445 = vmatmul.mubr.f32.vlgmr.msra.gmra.mrb[0].mxu1 %v6118_v46  ;;  %v965_v46 = vsel %vm511_vm5, %v5791_v5, 0  ;;  %v1034_v5 = vsub.f32 %v962_v14, %v6206_v1 }
 0x170   : > { %4448 = vmatpush3.msra.mxu1 %v1420_v45  ;;  %4449 = vmatprep.mubr.msk.f32.mxu1 %vm5396_vm2, %v7738_v55  ;;  %v6208_v44 = vand.u32 4294901760, %v965_v46 }
 0x171   : > { %4452 = vmatprep.subr.mxu1 %v7738_v55 }
 0x172   : > { %4390 = vmatmul.mubr.f32.vlgmr.msra.gmra.mrb[0].mxu0 %v7739_v52  ;;  %v7741_v52 = vand.u32 4294901760, %v5803_v11  ;;  %v7746_v11 = vand.u32 4294901760, %v5805_v12  ;;  %v7752_v12 = vand.u32 4294901760, %v5822_v23  ;;  %v7761_v23 = vand.u32 4294901760, %v5874_v43 }
 0x173   : > { %4393 = vmatpush3.msra.mxu0 %v594_v27  ;;  %4394 = vmatprep.mubr.msk.f32.mxu0 %vm5396_vm2, %v7738_v55  ;;  %v1045_v27 = vsub.f32 %v965_v46, %v6208_v44  ;;  %v7743_v46 = vand.u32 4294901760, %v5818_v21  ;;  %v7750_v21 = vand.u32 4294901760, %v5814_v18  ;;  %v7756_v18 = vand.u32 4294901760, %v5844_v30 }
 0x174   : > { %4397 = vmatprep.subr.mxu0 %v7738_v55  ;;  %v7765_v30 = vand.u32 4294901760, %v5896_v50  ;;  %v7774_v50 = vand.u32 4294901760, %v5959_v58  ;;  %v7780_v58 = vand.u32 4294901760, %v5982_v39  ;;  %v7788_v39 = vand.u32 4294901760, %v6028_v60 }
 0x175   : > { %v1046_v2 = vand.u32 4294901760, %v1045_v27  ;;  %v7798_v60 = vand.u32 4294901760, %v6095_v59 }
 0x177   : > { %4450 = vmatmul.mubr.f32.vlgmr.msra.gmra.mrb[0].mxu1 %v1487_v0  ;;  %v6220_v0 = vand.u32 4294901760, %v1866_v38  ;;  %v1047_v25 = vsub.f32 %v1045_v27, %v1046_v2 }
 0x178   : > { %4453 = vmatpush3.msra.mxu1 %v1498_v24  ;;  %4454 = vmatprep.mubr.msk.f32.mxu1 %vm5396_vm2, %v7738_v55  ;;  %v1035_v24 = vand.u32 4294901760, %v1034_v5 }
 0x179   : > { %4457 = vmatprep.subr.mxu1 %v7738_v55  ;;  %v1935_v35 = vsub.f32 %v1866_v38, %v6220_v0  ;;  %v1048_v31 = vand.u32 4294901760, %v1047_v25  ;;  %v7747_v38 = vand.u32 4294901760, %v5809_v15  ;;  %v7753_v15 = vand.u32 4294901760, %v5840_v28 }
 0x17a   : > { %4395 = vmatmul.mubr.f32.vlgmr.msra.gmra.mrb[0].mxu0 %v5984_v37  ;;  %v7762_v28 = vand.u32 4294901760, %v5892_v48  ;;  %v7770_v48 = vand.u32 4294901760, %v5943_v4 }
 0x17b   : > { %4398 = vmatpush3.msra.mxu0 %v6161_v34  ;;  %4399 = vmatprep.mubr.msk.f32.mxu0 %vm5396_vm2, %v7738_v55  ;;  %v1036_v34 = vsub.f32 %v1034_v5, %v1035_v24  ;;  %v1936_v32 = vand.u32 4294901760, %v1935_v35 }
 0x17c   : > { %4402 = vmatprep.subr.mxu0 %v7738_v55 }
 0x17d   : > { %v1037_v26 = vand.u32 4294901760, %v1036_v34  ;;  %v6326_v34 = vpack.c.bf16 %v7762_v28, %v7761_v23  ;;  %v2340_v23 = vld [vmem:[#allocation8 + $0xd0] sm:$0xff] }
 0x17f   : > { %4455 = vmatmul.mubr.f32.vlgmr.msra.gmra.mrb[0].mxu1 %v6054_v8  ;;  %7763 = vst [vmem:[#allocation72_spill] sm:$0xff] %v6326_v34 }
 0x180   : > { %4458 = vmatpush3.msra.mxu1 %v1420_v45  ;;  %4459 = vmatprep.mubr.msk.f32.mxu1 %vm5396_vm2, %v7738_v55  ;;  %v1937_v45 = vsub.f32 %v1935_v35, %v1936_v32 }
 0x181   : > { %4462 = vmatprep.subr.mxu1 %v7738_v55 }
 0x182   : > { %4400 = vmatmul.mubr.f32.vlgmr.msra.gmra.mrb[0].mxu0 %v5984_v37  ;;  %v1938_v37 = vand.u32 4294901760, %v1937_v45  ;;  %v7782_v45 = vand.u32 4294901760, %v6005_v13  ;;  %v7792_v13 = vand.u32 4294901760, %v6049_v41  ;;  %v7800_v41 = vand.u32 4294901760, %v6097_v62  ;;  %v2339_v62 = vld [vmem:[#allocation8 + $0xc8] sm:$0xff] }
 0x183   : > { %4403 = vmatpush3.msra.mxu0 %v6208_v44  ;;  %4404 = vmatprep.mubr.msk.f32.mxu0 %vm5396_vm2, %v7738_v55 }
 0x184   : > { %4407 = vmatprep.subr.mxu0 %v7738_v55 }
 0x187   : > { %4460 = vmatmul.mubr.f32.vlgmr.msra.gmra.mrb[0].mxu1 %v6054_v8  ;;  %v7740_v8 = vand.u32 4294901760, %v5801_v10  ;;  %v6281_v10 = vpack.c.bf16 %v7744_v63, %v7743_v46  ;;  %v7795_v46 = vand.u32 4294901760, %v6076_v20  ;;  %v6425_v20 = vld [vmem:[#allocation8 + $0x180] sm:$0xff] }
 0x188   : > { %4463 = vmatpush3.msra.mxu1 %v6208_v44  ;;  %4464 = vmatprep.mubr.msk.f32.mxu1 %vm5396_vm2, %v7738_v55 }
 0x189   : > { %4467 = vmatprep.subr.mxu1 %v7738_v55  ;;  %v6269_v14 = vpack.c.bf16 %v7741_v52, %v7740_v8  ;;  %7745 = vst [vmem:[#allocation66_spill] sm:$0xff] %v6281_v10 }
 0x18a   : > { %4405 = vmatmul.mubr.f32.vlgmr.msra.gmra.mrb[0].mxu0 %v1037_v26 }
 0x18b   : > { %4408 = vmatpush3.msra.mxu0 %v1048_v31  ;;  %4409 = vmatprep.mubr.msk.f32.mxu0 %vm5396_vm2, %v7738_v55  ;;  %7742 = vst [vmem:[#allocation65_spill] sm:$0xff] %v6269_v14 }
 0x18c   : > { %4412 = vmatprep.subr.mxu0 %v7738_v55 }
 0x18f   : > { %4465 = vmatmul.mubr.f32.vlgmr.msra.gmra.mrb[0].mxu1 %v1938_v37 }
 0x190   : > { %4468 = vmatpush3.msra.mxu1 %v1048_v31  ;;  %4469 = vmatprep.mubr.msk.f32.mxu1 %vm5396_vm2, %v7738_v55  ;;  %v7783_v31 = vand.u32 4294901760, %v6007_v9  ;;  %v7791_v9 = vand.u32 4294901760, %v6047_v61  ;;  %v7801_v61 = vand.u32 4294901760, %v6115_v51  ;;  %v2341_v51 = vld [vmem:[#allocation8 + $0xd8] sm:$0xff] }
 0x191   : > { %4472 = vmatprep.subr.mxu1 %v7738_v55 }
 0x192   : > { %4410 = vmatmul.mubr.f32.vlgmr.msra.gmra.mrb[0].mxu0 %v6206_v1  ;;  %v6377_v37 = vpack.c.bf16 %v7783_v31, %v7782_v45  ;;  %v2372_v31 = vld [vmem:[#allocation8 + $0x1c8] sm:$0xff] }
 0x193   : > { %4413 = vmatpush3.msra.mxu0 %v1045_v27  ;;  %4414 = vmatprep.mubr.msk.f32.mxu0 %vm5396_vm2, %v7738_v55 }
 0x194   : > { %4417 = vmatprep.subr.mxu0 %v7738_v55  ;;  %7784 = vst [vmem:[#allocation79_spill] sm:$0xff] %v6377_v37 }
 0x197   : > { %4470 = vmatmul.mubr.f32.vlgmr.msra.gmra.mrb[0].mxu1 %v6220_v0 }
 0x198   : > { %4473 = vmatpush3.msra.mxu1 %v1045_v27  ;;  %4474 = vmatprep.mubr.msk.f32.mxu1 %vm5396_vm2, %v7738_v55  ;;  %v7749_v27 = vand.u32 4294901760, %v5812_v17  ;;  %v7755_v17 = vand.u32 4294901760, %v5842_v29  ;;  %v7764_v29 = vand.u32 4294901760, %v5894_v49  ;;  %v7773_v49 = vand.u32 4294901760, %v5947_v7 }
 0x199   : > { %4477 = vmatprep.subr.mxu1 %v7738_v55 }
 0x19a   : > { %4415 = vmatmul.mubr.f32.vlgmr.msra.gmra.mrb[0].mxu0 %v1034_v5  ;;  %v6288_v5 = vpack.c.bf16 %v7747_v38, %v7746_v11  ;;  %v6297_v22 = vpack.c.bf16 %v7750_v21, %v7749_v27  ;;  %v6355_v26 = vpack.c.bf16 %v7774_v50, %v7773_v49  ;;  %v6419_v38 = vpack.c.bf16 %v7801_v61, %v7800_v41  ;;  %v6438_v50 = vld [vmem:[#allocation8 + $0xe8] sm:$0xff] }
 0x19b   : > { %4418 = vmatpush3.msra.mxu0 %v6208_v44  ;;  %4419 = vmatprep.mubr.msk.f32.mxu0 %vm5396_vm2, %v7738_v55  ;;  %v3283_v21 = vand.u32 4294901760, %v2339_v62 }
 0x19c   : > { %4422 = vmatprep.subr.mxu0 %v7738_v55  ;;  %7748 = vst [vmem:[#allocation67_spill] sm:$0xff] %v6288_v5  ;;  %7751 = vst [vmem:[#allocation68_spill] sm:$0xff] %v6297_v22 }
 0x19d   : > { %7775 = vst [vmem:[#allocation76_spill] sm:$0xff] %v6355_v26  ;;  %7802 = vst [vmem:[#allocation85_spill] sm:$0xff] %v6419_v38 }
 0x19f   : > { %4475 = vmatmul.mubr.f32.vlgmr.msra.gmra.mrb[0].mxu1 %v1935_v35  ;;  %v7759_v35 = vand.u32 4294901760, %v5872_v42  ;;  %v7768_v42 = vand.u32 4294901760, %v5910_v54  ;;  %v7777_v54 = vand.u32 4294901760, %v5963_v47  ;;  %v7785_v47 = vand.u32 4294901760, %v6009_v16 }
 0x1a0   : > { %4478 = vmatpush3.msra.mxu1 %v6208_v44  ;;  %4479 = vmatprep.mubr.msk.f32.mxu1 %vm5396_vm2, %v7738_v55  ;;  %v6399_v16 = vpack.c.bf16 %v7792_v13, %v7791_v9  ;;  %v2344_v9 = vld [vmem:[#allocation8 + $0xf0] sm:$0xff] }
 0x1a1   : > { %4482 = vmatprep.subr.mxu1 %v7738_v55 }
 0x1a2   : > { %4420 = vmatmul.mubr.f32.vlgmr.msra.gmra.mrb[0].mxu0 %v1035_v24  ;;  %v6314_v24 = vpack.c.bf16 %v7756_v18, %v7755_v17  ;;  %7793 = vst [vmem:[#allocation82_spill] sm:$0xff] %v6399_v16  ;;  %v2370_v17 = vld [vmem:[#allocation8 + $0x1b8] sm:$0xff]  ;;  %v2338_v18 = vld [vmem:[#allocation8 + $0xc0] sm:$0xff] }
 0x1a3   : > { %4423 = vmatpush3.msra.mxu0 %v1046_v2  ;;  %4424 = vmatprep.mubr.msk.f32.mxu0 %vm5396_vm2, %v7738_v55  ;;  %v3285_v28 = vand.u32 4294901760, %v2338_v18 }
 0x1a4   : > { %4427 = vmatprep.subr.mxu0 %v7738_v55  ;;  %7757 = vst [vmem:[#allocation70_spill] sm:$0xff] %v6314_v24 }
 0x1a7   : > { %4480 = vmatmul.mubr.f32.vlgmr.msra.gmra.mrb[0].mxu1 %v1936_v32  ;;  %v6334_v32 = vpack.c.bf16 %v7765_v30, %v7764_v29  ;;  %v2367_v29 = vld [vmem:[#allocation8 + $0x1a0] sm:$0xff]  ;;  %v2369_v30 = vld [vmem:[#allocation8 + $0x1b0] sm:$0xff] }
 0x1a8   : > { %4483 = vmatpush3.msra.mxu1 %v1046_v2  ;;  %4484 = vmatprep.mubr.msk.f32.mxu1 %vm5396_vm2, %v7738_v55 }
 0x1a9   : > { %4487 = vmatprep.subr.mxu1 %v7738_v55  ;;  %7766 = vst [vmem:[#allocation73_spill] sm:$0xff] %v6334_v32 }
 0x1aa   : > { %4425 = vmatmul.mubr.f32.vlgmr.msra.gmra.mrb[0].mxu0 %v6206_v1 }
 0x1ab   : > { %4428 = vmatpush3.msra.mxu0 %v6208_v44  ;;  %4429 = vmatprep.mubr.msk.f32.mxu0 %vm5396_vm2, %v7738_v55 }
 0x1ac   : > { %4685 = vmatprep.subr.bf16.mxu0 %v6269_v14 }
 0x1af   : > { %4485 = vmatmul.mubr.f32.vlgmr.msra.gmra.mrb[0].mxu1 %v6220_v0 }
 0x1b0   : > { %4488 = vmatpush3.msra.mxu1 %v6208_v44  ;;  %4489 = vmatprep.mubr.msk.f32.mxu1 %vm5396_vm2, %v7738_v55  ;;  %v6306_v44 = vpack.c.bf16 %v7753_v15, %v7752_v12  ;;  %v3287_v12 = vand.u32 4294901760, %v2341_v51  ;;  %v2368_v15 = vld [vmem:[#allocation8 + $0x1a8] sm:$0xff] }
 0x1b1   : > { %4493 = vmatprep.subr.bf16.mxu1 %v6281_v10 }
 0x1b2   : > { %4430 = vmatmul.mubr.f32.vlgmr.msra.gmra.mrb[0].mxu0 %v6206_v1  ;;  %7754 = vst [vmem:[#allocation69_spill] sm:$0xff] %v6306_v44  ;;  %v7758_v1 = vand.u32 4294901760, %v5856_v33  ;;  %v7767_v33 = vand.u32 4294901760, %v5908_v53  ;;  %v7776_v53 = vand.u32 4294901760, %v5961_v56  ;;  %v7786_v56 = vand.u32 4294901760, %v6026_v3 }
 0x1b3   : > { %4687 = vmatpush1.bf16.msra.mxu0 %v6288_v5  ;;  %3331 = vmatprep.mubr.f32.mxu0 %v7738_v55  ;;  %v7794_v3 = vand.u32 4294901760, %v6074_v57  ;;  %v6427_v57 = vld [vmem:[#allocation8 + $0x190] sm:$0xff] }
 0x1b4   : > { %4689 = vmatprep.subr.bf16.mxu0 %v6297_v22  ;;  %v6320_v2 = vpack.c.bf16 %v7759_v35, %v7758_v1  ;;  %v6342_v43 = vpack.c.bf16 %v7768_v42, %v7767_v33  ;;  %v6363_v4 = vpack.c.bf16 %v7777_v54, %v7776_v53  ;;  %v6384_v8 = vpack.c.bf16 %v7786_v56, %v7785_v47  ;;  %v6440_v53 = vld [vmem:[#allocation8 + $0xf8] sm:$0xff]  ;;  %v2342_v56 = vld [vmem:[#allocation8 + $0xe0] sm:$0xff] }
 0x1b5   : > { %v6405_v63 = vpack.c.bf16 %v7795_v46, %v7794_v3  ;;  %v2418_v59 = vand.u32 4294901760, %v6427_v57  ;;  %v2420_v1 = vand.u32 4294901760, %v2368_v15  ;;  %v2424_v35 = vand.u32 4294901760, %v2370_v17  ;;  %v2374_v47 = vld [vmem:[#allocation8 + $0x1d8] sm:$0xff]  ;;  %v2371_v3 = vld [vmem:[#allocation8 + $0x1c0] sm:$0xff]  ;;  %v2373_v46 = vld [vmem:[#allocation8 + $0x1d0] sm:$0xff] }
 0x1b6   : > { %7760 = vst [vmem:[#allocation71_spill] sm:$0xff] %v6320_v2  ;;  %7769 = vst [vmem:[#allocation74_spill] sm:$0xff] %v6342_v43  ;;  %v6434_v33 = vpack.c.bf16 %v3287_v12, %v3283_v21  ;;  %v3289_v42 = vand.u32 4294901760, %v2340_v23  ;;  %v3295_v45 = vand.u32 4294901760, %v6440_v53  ;;  %v3293_v13 = vand.u32 4294901760, %v2342_v56 }
 0x1b7   : > { %4490 = vmatmul.mubr.f32.vlgmr.msra.gmra.mrb[0].mxu1 %v6220_v0  ;;  %4691 = vmatpush1.bf16.msra.mxu0 %v6306_v44  ;;  %v7771_v0 = vand.u32 4294901760, %v5945_v6  ;;  %7778 = vst [vmem:[#allocation77_spill] sm:$0xff] %v6363_v4  ;;  %v7779_v6 = vand.u32 4294901760, %v5980_v40  ;;  %7787 = vst [vmem:[#allocation80_spill] sm:$0xff] %v6384_v8  ;;  %v7789_v40 = vand.u32 4294901760, %v6030_v36  ;;  %v7797_v36 = vand.u32 4294901760, %v6093_v19 }
 0x1b8   : > { %4495 = vmatpush1.bf16.msra.mxu1 %v6314_v24  ;;  %4693 = vmatprep.subr.bf16.mxu0 %v6320_v2  ;;  %7796 = vst [vmem:[#allocation83_spill] sm:$0xff] %v6405_v63  ;;  %v2414_v19 = vand.u32 4294901760, %v6425_v20  ;;  %7804 = vst [vmem:[#allocation87_spill] sm:$0xff] %v6434_v33  ;;  %v6436_v49 = vpack.c.bf16 %v2424_v35, %v2420_v1  ;;  %v6443_v54 = vpack.c.bf16 %v3289_v42, %v3285_v28  ;;  %v7850_v44 = vld [vmem:[#allocation37_spill] sm:$0xff] }
 0x1b9   : > { %v6348_v25 = vpack.c.bf16 %v7771_v0, %v7770_v48  ;;  %4497 = vmatprep.subr.bf16.mxu1 %v6326_v34  ;;  %2476 = vmatprep.mubr.f32.mxu1 %v7738_v55  ;;  %v6371_v7 = vpack.c.bf16 %v7780_v58, %v7779_v6  ;;  %v6391_v52 = vpack.c.bf16 %v7789_v40, %v7788_v39  ;;  %v2422_v48 = vand.u32 4294901760, %v2367_v29 }
 0x1ba   : > { %v6412_v11 = vpack.c.bf16 %v7798_v60, %v7797_v36  ;;  %v6431_v27 = vpack.c.bf16 %v2418_v59, %v2414_v19  ;;  %v2426_v0 = vand.u32 4294901760, %v2369_v30  ;;  %7805 = vst [vmem:[#allocation88_spill] sm:$0xff] %v6436_v49  ;;  %7806 = vst [vmem:[#allocation89_spill] sm:$0xff] %v6443_v54  ;;  %v3291_v58 = vand.u32 4294901760, %v6438_v50 }
 0x1bb   : > { %7772 = vst [vmem:[#allocation75_spill] sm:$0xff] %v6348_v25  ;;  %4695 = vmatpush1.bf16.msra.mxu0 %v6334_v32  ;;  %7781 = vst [vmem:[#allocation78_spill] sm:$0xff] %v6371_v7  ;;  %v2428_v39 = vand.u32 4294901760, %v2372_v31  ;;  %v2432_v40 = vand.u32 4294901760, %v2374_v47  ;;  %v3297_v60 = vand.u32 4294901760, %v2344_v9  ;;  %v2430_v41 = vand.u32 4294901760, %v2371_v3 }
 0x1bc   : > { %4499 = vmatpush1.bf16.msra.mxu1 %v6342_v43  ;;  %4697 = vmatprep.subr.bf16.mxu0 %v6348_v25  ;;  %7790 = vst [vmem:[#allocation81_spill] sm:$0xff] %v6391_v52  ;;  %7799 = vst [vmem:[#allocation84_spill] sm:$0xff] %v6412_v11  ;;  %v6445_v6 = vpack.c.bf16 %v2426_v0, %v2422_v48  ;;  %v6452_v36 = vpack.c.bf16 %v3295_v45, %v3291_v58  ;;  %v2434_v61 = vand.u32 4294901760, %v2373_v46 }
 0x1bd   : > { %4501 = vmatprep.subr.bf16.mxu1 %v6355_v26  ;;  %7803 = vst [vmem:[#allocation86_spill] sm:$0xff] %v6431_v27  ;;  %v6474_v32 = vsub.f32 %v6425_v20, %v2414_v19  ;;  %v6477_v34 = vsub.f32 %v6427_v57, %v2418_v59  ;;  %v6481_v26 = vsub.f32 %v2341_v51, %v3287_v12  ;;  %v2377_v20 = vld [vmem:[#allocation8 + $0x1f0] sm:$0xff]  ;;  %v7517_v10 = vand.u32 4294901760, %v7850_v44 }
 0x1be   : > { %7807 = vst [vmem:[#allocation90_spill] sm:$0xff] %v6445_v6  ;;  %7808 = vst [vmem:[#allocation91_spill] sm:$0xff] %v6452_v36  ;;  %v6486_v2 = vsub.f32 %v2370_v17, %v2424_v35  ;;  %v6490_v24 = vsub.f32 %v2340_v23, %v3289_v42  ;;  %v6493_v57 = vsub.f32 %v2367_v29, %v2422_v48  ;;  %v2442_v35 = vand.u32 4294901760, %v2377_v20  ;;  %v7828_v29 = vld [vmem:[#allocation28_spill] sm:$0xff] }
 0x1bf   : > { %4699 = vmatpush1.bf16.msra.mxu0 %v6363_v4  ;;  %v7816_v4 = vld [vmem:[#allocation27_spill] sm:$0xff]  ;;  %v6495_v19 = vsub.f32 %v2369_v30, %v2426_v0  ;;  %v6510_v30 = vsub.f32 %v6438_v50, %v3291_v58  ;;  %v6513_v42 = vsub.f32 %v6440_v53, %v3295_v45  ;;  %v6515_v48 = vsub.f32 %v2372_v31, %v2428_v39 }
 0x1c0   : > { %4503 = vmatpush1.bf16.msra.mxu1 %v6371_v7  ;;  %4701 = vmatprep.subr.bf16.mxu0 %v6377_v37  ;;  %v7815_v37 = vld [vmem:[#allocation26_spill] sm:$0xff]  ;;  %v6479_v7 = vsub.f32 %v2339_v62, %v3283_v21  ;;  %7820 = vst [vmem:[#allocation27_spill] sm:$0xff] %v6486_v2  ;;  %7822 = vst [vmem:[#allocation94_spill] sm:$0xff] %v6493_v57  ;;  %v7827_v23 = vand.u32 4294901760, %v7816_v4  ;;  %v6517_v0 = vsub.f32 %v2374_v47, %v2432_v40 }
 0x1c1   : > { %4505 = vmatprep.subr.bf16.mxu1 %v6384_v8  ;;  %v2378_v8 = vld [vmem:[#allocation8 + $0x1f8] sm:$0xff]  ;;  %7819 = vst [vmem:[#allocation26_spill] sm:$0xff] %v6481_v26  ;;  %7823 = vst [vmem:[#allocation95_spill] sm:$0xff] %v6495_v19 }
 0x1c2   : > { %v2440_v43 = vand.u32 4294901760, %v2378_v8  ;;  %7829 = vst [vmem:[#allocation28_spill] sm:$0xff] %v6515_v48  ;;  %7830 = vst [vmem:[#allocation97_spill] sm:$0xff] %v6517_v0 }
 0x1c3   : > { %4703 = vmatpush1.bf16.msra.mxu0 %v6391_v52  ;;  %v6460_v52 = vpack.c.bf16 %v3297_v60, %v3293_v13 }
 0x1c4   : > { %4507 = vmatpush1.bf16.msra.mxu1 %v6399_v16  ;;  %4705 = vmatprep.subr.bf16.mxu0 %v6405_v63  ;;  %v7812_v63 = vld [vmem:[#allocation25_spill] sm:$0xff]  ;;  %v6530_v58 = vsub.f32 %v2378_v8, %v2440_v43  ;;  %v7843_v8 = vld [vmem:[#allocation31_spill] sm:$0xff] }
 0x1c5   : > { %4509 = vmatprep.subr.bf16.mxu1 %v6412_v11  ;;  %7818 = vst [vmem:[#allocation25_spill] sm:$0xff] %v6474_v32  ;;  %v7825_v21 = vand.u32 4294901760, %v7812_v63 }
 0x1c6   : > { %7836 = vst [vmem:[#allocation103_spill] sm:$0xff] %v6530_v58 }
 0x1c7   : > { %4707 = vmatpush1.bf16.msra.mxu0 %v6419_v38  ;;  %v3352_v12 = vsub.f32 %v7812_v63, %v7825_v21  ;;  %v6526_v21 = vsub.f32 %v2373_v46, %v2434_v61  ;;  %v7844_v46 = vld [vmem:[#allocation32_spill] sm:$0xff] }
 0x1c8   : > { %4511 = vmatpush1.bf16.msra.mxu1 %v6431_v27  ;;  %4709 = vmatprep.subr.bf16.mxu0 %v6434_v33  ;;  %v6454_v33 = vpack.c.bf16 %v2432_v40, %v2428_v39  ;;  %v7810_v27 = vld [vmem:[#allocation23_spill] sm:$0xff]  ;;  %v6536_v39 = vsub.f32 %v2377_v20, %v2442_v35 }
 0x1c9   : > { %4513 = vmatprep.subr.bf16.mxu1 %v6436_v49  ;;  %v7489_v38 = vand.u32 4294901760, %v7810_v27  ;;  %v7811_v49 = vld [vmem:[#allocation24_spill] sm:$0xff]  ;;  %7813 = vst [vmem:[#allocation23_spill] sm:$0xff] %v6460_v52  ;;  %7834 = vst [vmem:[#allocation101_spill] sm:$0xff] %v6526_v21  ;;  %v3353_v53 = vand.u32 4294901760, %v3352_v12 }
 0x1ca   : > { %7809 = vst [vmem:[#allocation92_spill] sm:$0xff] %v6454_v33  ;;  %v7817_v16 = vand.u32 4294901760, %v7811_v49  ;;  %7839 = vst [vmem:[#allocation106_spill] sm:$0xff] %v6536_v39 }
 0x1cb   : > { %4711 = vmatpush1.bf16.msra.mxu0 %v6443_v54  ;;  %v6462_v54 = vpack.c.bf16 %v2434_v61, %v2430_v41  ;;  %v3346_v11 = vsub.f32 %v7810_v27, %v7489_v38  ;;  %v6484_v38 = vsub.f32 %v2368_v15, %v2420_v1  ;;  %v7826_v15 = vand.u32 4294901760, %v7815_v37  ;;  %v7846_v61 = vld [vmem:[#allocation34_spill] sm:$0xff] }
 0x1cc   : > { %4515 = vmatpush1.bf16.msra.mxu1 %v6445_v6  ;;  %4713 = vmatprep.subr.bf16.mxu0 %v6452_v36  ;;  %v2376_v6 = vld [vmem:[#allocation8 + $0x1e8] sm:$0xff]  ;;  %v3358_v36 = vsub.f32 %v7811_v49, %v7817_v16  ;;  %v6488_v16 = vsub.f32 %v2338_v18, %v3285_v28  ;;  %v3370_v28 = vsub.f32 %v7816_v4, %v7827_v23  ;;  %v7514_v20 = vand.u32 4294901760, %v7846_v61 }
 0x1cd   : > { %7814 = vst [vmem:[#allocation24_spill] sm:$0xff] %v6462_v54  ;;  %4517 = vmatprep.subr.bf16.mxu1 %v6454_v33  ;;  %v2436_v25 = vand.u32 4294901760, %v2376_v6  ;;  %v2375_v33 = vld [vmem:[#allocation8 + $0x1e0] sm:$0xff]  ;;  %v3347_v59 = vand.u32 4294901760, %v3346_v11  ;;  %v3364_v17 = vsub.f32 %v7815_v37, %v7826_v15  ;;  %v7497_v11 = vand.u32 4294901760, %v7828_v29 }
 0x1ce   : > { %7821 = vst [vmem:[#allocation93_spill] sm:$0xff] %v6488_v16  ;;  %v3359_v62 = vand.u32 4294901760, %v3358_v36  ;;  %v2438_v18 = vand.u32 4294901760, %v2375_v33  ;;  %v6520_v36 = vsub.f32 %v2342_v56, %v3293_v13  ;;  %v3371_v56 = vand.u32 4294901760, %v3370_v28  ;;  %v7841_v13 = vld [vmem:[#allocation29_spill] sm:$0xff] }
 0x1cf   : > { %4715 = vmatpush1.bf16.msra.mxu0 %v6460_v52  ;;  %v6497_v51 = vpack.c.bf16 %v2440_v43, %v2436_v25  ;;  %v6528_v50 = vsub.f32 %v2376_v6, %v2436_v25  ;;  %v3365_v45 = vand.u32 4294901760, %v3364_v17  ;;  %v7496_v25 = vand.u32 4294901760, %v7841_v13  ;;  %v7842_v6 = vld [vmem:[#allocation30_spill] sm:$0xff]  ;;  %v7849_v52 = vld [vmem:[#allocation36_spill] sm:$0xff] }
 0x1d0   : > { %4519 = vmatpush1.bf16.msra.mxu1 %v6462_v54  ;;  %v4716_v1 = vpack.c.bf16 %v3359_v62, %v3347_v59  ;;  %7831 = vst [vmem:[#allocation98_spill] sm:$0xff] %v6520_v36  ;;  %v6522_v59 = vsub.f32 %v2344_v9, %v3297_v60  ;;  %v6524_v62 = vsub.f32 %v2371_v3, %v2430_v41  ;;  %v7494_v43 = vand.u32 4294901760, %v7842_v6  ;;  %v7845_v60 = vld [vmem:[#allocation33_spill] sm:$0xff] }
 0x1d1   : > { %7824 = vst [vmem:[#allocation96_spill] sm:$0xff] %v6497_v51  ;;  %4521 = vmatprep.subr.bf16.mxu1 %v6497_v51  ;;  %7835 = vst [vmem:[#allocation102_spill] sm:$0xff] %v6528_v50  ;;  %v6532_v31 = vpack.c.bf16 %v2442_v35, %v2438_v18  ;;  %v6534_v47 = vsub.f32 %v2375_v33, %v2438_v18  ;;  %v6538_v40 = vpack.c.bf16 %v3365_v45, %v3353_v53  ;;  %v7847_v18 = vld [vmem:[#allocation35_spill] sm:$0xff] }
 0x1d2   : > { %7832 = vst [vmem:[#allocation99_spill] sm:$0xff] %v6522_v59  ;;  %7833 = vst [vmem:[#allocation100_spill] sm:$0xff] %v6524_v62  ;;  %4717 = vmatprep.subr.bf16.mxu0 %v4716_v1  ;;  %v3382_v9 = vsub.f32 %v7828_v29, %v7497_v11  ;;  %v7495_v3 = vand.u32 4294901760, %v7843_v8  ;;  %v7500_v33 = vand.u32 4294901760, %v7844_v46  ;;  %v7507_v41 = vand.u32 4294901760, %v7845_v60 }
 0x1d3   : > { %7837 = vst [vmem:[#allocation104_spill] sm:$0xff] %v6532_v31  ;;  %7838 = vst [vmem:[#allocation105_spill] sm:$0xff] %v6534_v47  ;;  %v2491_v15 = vsub.f32 %v7841_v13, %v7496_v25  ;;  %v2503_v17 = vsub.f32 %v7842_v6, %v7494_v43  ;;  %v7516_v1 = vand.u32 4294901760, %v7847_v18  ;;  %v2509_v53 = vsub.f32 %v7846_v61, %v7514_v20  ;;  %v7905_v61 = vld [vmem:[#allocation47_spill] sm:$0xff] }
 0x1d4   : > { %7840 = vst [vmem:[#allocation107_spill] sm:$0xff] %v6538_v40  ;;  %4523 = vmatpush1.bf16.msra.mxu1 %v6532_v31  ;;  %v3383_v12 = vand.u32 4294901760, %v3382_v9  ;;  %v3376_v35 = vsub.f32 %v7843_v8, %v7495_v3  ;;  %v3388_v23 = vsub.f32 %v7844_v46, %v7500_v33  ;;  %v2497_v28 = vsub.f32 %v7845_v60, %v7507_v41  ;;  %v7903_v8 = vld [vmem:[#allocation45_spill] sm:$0xff] }
 0x1d5   : > { %v2492_v9 = vand.u32 4294901760, %v2491_v15  ;;  %v2504_v43 = vand.u32 4294901760, %v2503_v17  ;;  %v3394_v3 = vsub.f32 %v7847_v18, %v7516_v1  ;;  %v2510_v33 = vand.u32 4294901760, %v2509_v53  ;;  %v7854_v17 = vld [vmem:[#allocation39_spill] sm:$0xff] }
 0x1d6   : > { %v6569_v45 = vpack.c.bf16 %v3383_v12, %v3371_v56  ;;  %v3377_v25 = vand.u32 4294901760, %v3376_v35  ;;  %v3389_v11 = vand.u32 4294901760, %v3388_v23  ;;  %v2498_v31 = vand.u32 4294901760, %v2497_v28  ;;  %v7853_v12 = vld [vmem:[#allocation38_spill] sm:$0xff]  ;;  %v7856_v28 = vld [vmem:[#allocation41_spill] sm:$0xff]  ;;  %v7858_v53 = vld [vmem:[#allocation43_spill] sm:$0xff] }
 0x1d7   : > { %v4524_v51 = vpack.c.bf16 %v2504_v43, %v2492_v9  ;;  %v3395_v54 = vand.u32 4294901760, %v3394_v3  ;;  %v7515_v41 = vand.u32 4294901760, %v7849_v52  ;;  %v7522_v15 = vand.u32 4294901760, %v7853_v12  ;;  %v7855_v3 = vld [vmem:[#allocation40_spill] sm:$0xff] }
 0x1d8   : > { %7848 = vst [vmem:[#allocation30_spill] sm:$0xff] %v6569_v45  ;;  %v6576_v22 = vpack.c.bf16 %v3389_v11, %v3377_v25  ;;  %v6578_v56 = vpack.c.bf16 %v2510_v33, %v2498_v31  ;;  %v7523_v20 = vand.u32 4294901760, %v7854_v17  ;;  %v2515_v43 = vsub.f32 %v7850_v44, %v7517_v10  ;;  %v7857_v25 = vld [vmem:[#allocation42_spill] sm:$0xff]  ;;  %v7860_v45 = vld [vmem:[#allocation44_spill] sm:$0xff] }
 0x1d9   : > { %4525 = vmatprep.subr.bf16.mxu1 %v4524_v51  ;;  %v3406_v35 = vsub.f32 %v7849_v52, %v7515_v41  ;;  %v7524_v23 = vand.u32 4294901760, %v7855_v3  ;;  %v7526_v11 = vand.u32 4294901760, %v7856_v28  ;;  %v2527_v31 = vsub.f32 %v7853_v12, %v7522_v15  ;;  %v7910_v44 = vld [vmem:[#allocation52_spill] sm:$0xff]  ;;  %v7917_v52 = vld [vmem:[#allocation25_spill] sm:$0xff] }
 0x1da   : > { %7851 = vst [vmem:[#allocation32_spill] sm:$0xff] %v6576_v22  ;;  %7852 = vst [vmem:[#allocation108_spill] sm:$0xff] %v6578_v56  ;;  %v3400_v51 = vsub.f32 %v7854_v17, %v7523_v20  ;;  %v7528_v33 = vand.u32 4294901760, %v7857_v25  ;;  %v7530_v9 = vand.u32 4294901760, %v7858_v53  ;;  %v2516_v1 = vand.u32 4294901760, %v2515_v43  ;;  %v7911_v17 = vld [vmem:[#allocation53_spill] sm:$0xff] }
 0x1db   : > { %v3407_v41 = vand.u32 4294901760, %v3406_v35  ;;  %v3412_v10 = vsub.f32 %v7855_v3, %v7524_v23  ;;  %v2521_v5 = vsub.f32 %v7856_v28, %v7526_v11  ;;  %v2528_v14 = vand.u32 4294901760, %v2527_v31  ;;  %v7862_v31 = vld [vmem:[#allocation45_spill] sm:$0xff]  ;;  %v7912_v3 = vld [vmem:[#allocation54_spill] sm:$0xff] }
 0x1dc   : > { %v3401_v15 = vand.u32 4294901760, %v3400_v51  ;;  %v2533_v20 = vsub.f32 %v7857_v25, %v7528_v33  ;;  %v3418_v56 = vsub.f32 %v7858_v53, %v7530_v9  ;;  %v7531_v23 = vand.u32 4294901760, %v7860_v45  ;;  %v7864_v25 = vld [vmem:[#allocation46_spill] sm:$0xff]  ;;  %v7915_v53 = vld [vmem:[#allocation57_spill] sm:$0xff] }
 0x1dd   : > { %v6610_v35 = vpack.c.bf16 %v3407_v41, %v3395_v54  ;;  %v3413_v43 = vand.u32 4294901760, %v3412_v10  ;;  %v2522_v22 = vand.u32 4294901760, %v2521_v5  ;;  %v6613_v55 = vpack.c.bf16 %v2528_v14, %v2516_v1  ;;  %v7865_v54 = vld [vmem:[#allocation47_spill] sm:$0xff]  ;;  %v7867_v5 = vld [vmem:[#allocation48_spill] sm:$0xff]  ;;  %v7868_v1 = vld [vmem:[#allocation49_spill] sm:$0xff] }
 0x1de   : > { %v2534_v40 = vand.u32 4294901760, %v2533_v20  ;;  %v3419_v11 = vand.u32 4294901760, %v3418_v56  ;;  %v7532_v51 = vand.u32 4294901760, %v7862_v31  ;;  %v3430_v33 = vsub.f32 %v7860_v45, %v7531_v23 }
 0x1df   : > { %7859 = vst [vmem:[#allocation38_spill] sm:$0xff] %v6610_v35  ;;  %7861 = vst [vmem:[#allocation109_spill] sm:$0xff] %v6613_v55  ;;  %v6616_v28 = vpack.c.bf16 %v3413_v43, %v3401_v15  ;;  %v7533_v9 = vand.u32 4294901760, %v7864_v25  ;;  %v7535_v41 = vand.u32 4294901760, %v7865_v54  ;;  %v7537_v20 = vand.u32 4294901760, %v7867_v5 }
 0x1e0   : > { %v6623_v10 = vpack.c.bf16 %v2534_v40, %v2522_v22  ;;  %v2539_v14 = vsub.f32 %v7862_v31, %v7532_v51  ;;  %v7541_v56 = vand.u32 4294901760, %v7868_v1  ;;  %v3431_v15 = vand.u32 4294901760, %v3430_v33  ;;  %v7870_v33 = vld [vmem:[#allocation51_spill] sm:$0xff] }
 0x1e1   : > { %7863 = vst [vmem:[#allocation110_spill] sm:$0xff] %v6616_v28  ;;  %v2551_v43 = vsub.f32 %v7864_v25, %v7533_v9  ;;  %v3424_v23 = vsub.f32 %v7865_v54, %v7535_v41  ;;  %v7869_v28 = vld [vmem:[#allocation50_spill] sm:$0xff]  ;;  %v3436_v51 = vsub.f32 %v7867_v5, %v7537_v20  ;;  %v7546_v55 = vand.u32 4294901760, %v7870_v33  ;;  %v7872_v5 = vld [vmem:[#allocation52_spill] sm:$0xff] }
 0x1e2   : > { %7866 = vst [vmem:[#allocation111_spill] sm:$0xff] %v6623_v10  ;;  %v7543_v22 = vand.u32 4294901760, %v7869_v28  ;;  %v2540_v40 = vand.u32 4294901760, %v2539_v14  ;;  %v2545_v10 = vsub.f32 %v7868_v1, %v7541_v56  ;;  %v6644_v35 = vpack.c.bf16 %v3431_v15, %v3419_v11  ;;  %v7874_v1 = vld [vmem:[#allocation53_spill] sm:$0xff]  ;;  %v7875_v15 = vld [vmem:[#allocation54_spill] sm:$0xff] }
 0x1e3   : > { %v2552_v9 = vand.u32 4294901760, %v2551_v43  ;;  %v3425_v25 = vand.u32 4294901760, %v3424_v23  ;;  %v3437_v54 = vand.u32 4294901760, %v3436_v51  ;;  %v3442_v20 = vsub.f32 %v7870_v33, %v7546_v55 }
 0x1e4   : > { %7871 = vst [vmem:[#allocation112_spill] sm:$0xff] %v6644_v35  ;;  %v2557_v41 = vsub.f32 %v7869_v28, %v7543_v22  ;;  %v2546_v14 = vand.u32 4294901760, %v2545_v10  ;;  %v7545_v31 = vand.u32 4294901760, %v7872_v5  ;;  %v7547_v11 = vand.u32 4294901760, %v7874_v1  ;;  %v7877_v10 = vld [vmem:[#allocation55_spill] sm:$0xff] }
 0x1e5   : > { %v6653_v45 = vpack.c.bf16 %v2552_v9, %v2540_v40  ;;  %v7549_v43 = vand.u32 4294901760, %v7875_v15  ;;  %v6657_v23 = vpack.c.bf16 %v3437_v54, %v3425_v25  ;;  %v3443_v35 = vand.u32 4294901760, %v3442_v20  ;;  %v7879_v40 = vld [vmem:[#allocation56_spill] sm:$0xff] }
 0x1e6   : > { %v2558_v56 = vand.u32 4294901760, %v2557_v41  ;;  %v3454_v51 = vsub.f32 %v7872_v5, %v7545_v31  ;;  %v7551_v22 = vand.u32 4294901760, %v7877_v10  ;;  %v2563_v9 = vsub.f32 %v7874_v1, %v7547_v11  ;;  %v7880_v31 = vld [vmem:[#allocation57_spill] sm:$0xff]  ;;  %v7887_v5 = vld [vmem:[#allocation62_spill] sm:$0xff] }
 0x1e7   : > { %7873 = vst [vmem:[#allocation113_spill] sm:$0xff] %v6653_v45  ;;  %7876 = vst [vmem:[#allocation114_spill] sm:$0xff] %v6657_v23  ;;  %v2575_v41 = vsub.f32 %v7875_v15, %v7549_v43  ;;  %v7553_v25 = vand.u32 4294901760, %v7879_v40  ;;  %v7557_v55 = vand.u32 4294901760, %v7880_v31  ;;  %v7881_v23 = vld [vmem:[#allocation58_spill] sm:$0xff]  ;;  %v7882_v45 = vld [vmem:[#allocation59_spill] sm:$0xff] }
 0x1e8   : > { %v6663_v28 = vpack.c.bf16 %v2558_v56, %v2546_v14  ;;  %v3455_v54 = vand.u32 4294901760, %v3454_v51  ;;  %v3448_v20 = vsub.f32 %v7877_v10, %v7551_v22  ;;  %v7559_v56 = vand.u32 4294901760, %v7881_v23 }
 0x1e9   : > { %v2564_v14 = vand.u32 4294901760, %v2563_v9  ;;  %v3460_v11 = vsub.f32 %v7879_v40, %v7553_v25  ;;  %v7560_v1 = vand.u32 4294901760, %v7882_v45  ;;  %v2569_v51 = vsub.f32 %v7880_v31, %v7557_v55  ;;  %v7885_v25 = vld [vmem:[#allocation60_spill] sm:$0xff] }
 0x1ea   : > { %7878 = vst [vmem:[#allocation115_spill] sm:$0xff] %v6663_v28  ;;  %v2576_v28 = vand.u32 4294901760, %v2575_v41  ;;  %v6681_v43 = vpack.c.bf16 %v3455_v54, %v3443_v35  ;;  %v3449_v15 = vand.u32 4294901760, %v3448_v20  ;;  %v2581_v22 = vsub.f32 %v7881_v23, %v7559_v56  ;;  %v7886_v20 = vld [vmem:[#allocation61_spill] sm:$0xff] }
 0x1eb   : > { %v3461_v9 = vand.u32 4294901760, %v3460_v11  ;;  %v3466_v41 = vsub.f32 %v7882_v45, %v7560_v1  ;;  %v7561_v40 = vand.u32 4294901760, %v7885_v25  ;;  %v2570_v35 = vand.u32 4294901760, %v2569_v51  ;;  %v7889_v11 = vld [vmem:[#allocation63_spill] sm:$0xff]  ;;  %v7891_v1 = vld [vmem:[#allocation64_spill] sm:$0xff] }
 0x1ec   : > { %7883 = vst [vmem:[#allocation58_spill] sm:$0xff] %v6681_v43  ;;  %v6689_v10 = vpack.c.bf16 %v2576_v28, %v2564_v14  ;;  %v2582_v54 = vand.u32 4294901760, %v2581_v22  ;;  %v7562_v43 = vand.u32 4294901760, %v7886_v20  ;;  %v7563_v33 = vand.u32 4294901760, %v7887_v5 }
 0x1ed   : > { %v6697_v55 = vpack.c.bf16 %v3461_v9, %v3449_v15  ;;  %v3467_v31 = vand.u32 4294901760, %v3466_v41  ;;  %v3478_v28 = vsub.f32 %v7885_v25, %v7561_v40  ;;  %v7564_v14 = vand.u32 4294901760, %v7889_v11 }
 0x1ee   : > { %7884 = vst [vmem:[#allocation59_spill] sm:$0xff] %v6689_v10  ;;  %v6703_v56 = vpack.c.bf16 %v2582_v54, %v2570_v35  ;;  %v2587_v51 = vsub.f32 %v7886_v20, %v7562_v43  ;;  %v2599_v22 = vsub.f32 %v7887_v5, %v7563_v33  ;;  %v7566_v15 = vand.u32 4294901760, %v7891_v1 }
 0x1ef   : > { %7888 = vst [vmem:[#allocation60_spill] sm:$0xff] %v6697_v55  ;;  %v3479_v9 = vand.u32 4294901760, %v3478_v28  ;;  %v3472_v41 = vsub.f32 %v7889_v11, %v7564_v14  ;;  %v7567_v40 = vand.u32 4294901760, %v6474_v32  ;;  %v7573_v35 = vand.u32 4294901760, %v6477_v34 }
 0x1f0   : > { %7890 = vst [vmem:[#allocation61_spill] sm:$0xff] %v6703_v56  ;;  %v2588_v54 = vand.u32 4294901760, %v2587_v51  ;;  %v2600_v56 = vand.u32 4294901760, %v2599_v22  ;;  %v3484_v43 = vsub.f32 %v7891_v1, %v7566_v15  ;;  %v7571_v55 = vand.u32 4294901760, %v6479_v7 }
 0x1f1   : > { %v6721_v33 = vpack.c.bf16 %v3479_v9, %v3467_v31  ;;  %v3473_v10 = vand.u32 4294901760, %v3472_v41  ;;  %v2593_v28 = vsub.f32 %v6474_v32, %v7567_v40  ;;  %v2605_v14 = vsub.f32 %v6477_v34, %v7573_v35 }
 0x1f2   : > { %v6729_v11 = vpack.c.bf16 %v2600_v56, %v2588_v54  ;;  %v3485_v51 = vand.u32 4294901760, %v3484_v43  ;;  %v3490_v22 = vsub.f32 %v6479_v7, %v7571_v55  ;;  %v7570_v15 = vand.u32 4294901760, %v6481_v26 }
 0x1f3   : > { %7892 = vst [vmem:[#allocation116_spill] sm:$0xff] %v6721_v33  ;;  %v2594_v31 = vand.u32 4294901760, %v2593_v28  ;;  %v2606_v9 = vand.u32 4294901760, %v2605_v14  ;;  %v7572_v41 = vand.u32 4294901760, %v6484_v38  ;;  %v7574_v33 = vand.u32 4294901760, %v6486_v2 }
 0x1f4   : > { %7893 = vst [vmem:[#allocation117_spill] sm:$0xff] %v6729_v11  ;;  %v6737_v40 = vpack.c.bf16 %v3485_v51, %v3473_v10  ;;  %v3491_v32 = vand.u32 4294901760, %v3490_v22  ;;  %v3502_v56 = vsub.f32 %v6481_v26, %v7570_v15  ;;  %v7575_v43 = vand.u32 4294901760, %v6488_v16 }
 0x1f5   : > { %v6743_v54 = vpack.c.bf16 %v2606_v9, %v2594_v31  ;;  %v2611_v28 = vsub.f32 %v6484_v38, %v7572_v41  ;;  %v2623_v14 = vsub.f32 %v6486_v2, %v7574_v33  ;;  %v7576_v10 = vand.u32 4294901760, %v6490_v24 }
 0x1f6   : > { %7894 = vst [vmem:[#allocation118_spill] sm:$0xff] %v6737_v40  ;;  %v3503_v51 = vand.u32 4294901760, %v3502_v56  ;;  %v3496_v22 = vsub.f32 %v6488_v16, %v7575_v43  ;;  %v7577_v15 = vand.u32 4294901760, %v6493_v57  ;;  %v7582_v31 = vand.u32 4294901760, %v6495_v19 }
 0x1f7   : > { %7895 = vst [vmem:[#allocation119_spill] sm:$0xff] %v6743_v54  ;;  %v2612_v9 = vand.u32 4294901760, %v2611_v28  ;;  %v2624_v55 = vand.u32 4294901760, %v2623_v14  ;;  %v3508_v41 = vsub.f32 %v6490_v24, %v7576_v10  ;;  %v7579_v35 = vand.u32 4294901760, %v6510_v30 }
 0x1f8   : > { %v6761_v33 = vpack.c.bf16 %v3503_v51, %v3491_v32  ;;  %v3497_v54 = vand.u32 4294901760, %v3496_v22  ;;  %v2617_v56 = vsub.f32 %v6493_v57, %v7577_v15  ;;  %v2629_v43 = vsub.f32 %v6495_v19, %v7582_v31 }
 0x1f9   : > { %v6769_v40 = vpack.c.bf16 %v2624_v55, %v2612_v9  ;;  %v3509_v28 = vand.u32 4294901760, %v3508_v41  ;;  %v3514_v14 = vsub.f32 %v6510_v30, %v7579_v35  ;;  %v7578_v10 = vand.u32 4294901760, %v6513_v42 }
 0x1fa   : > { %7896 = vst [vmem:[#allocation120_spill] sm:$0xff] %v6761_v33  ;;  %v2618_v32 = vand.u32 4294901760, %v2617_v56  ;;  %v2630_v51 = vand.u32 4294901760, %v2629_v43  ;;  %v7580_v22 = vand.u32 4294901760, %v6515_v48  ;;  %v7581_v33 = vand.u32 4294901760, %v6517_v0 }
 0x1fb   : > { %7897 = vst [vmem:[#allocation121_spill] sm:$0xff] %v6769_v40  ;;  %v6777_v15 = vpack.c.bf16 %v3509_v28, %v3497_v54  ;;  %v3515_v11 = vand.u32 4294901760, %v3514_v14  ;;  %v3526_v55 = vsub.f32 %v6513_v42, %v7578_v10  ;;  %v7583_v41 = vand.u32 4294901760, %v6520_v36 }
 0x1fc   : > { %v6783_v9 = vpack.c.bf16 %v2630_v51, %v2618_v32  ;;  %v2635_v56 = vsub.f32 %v6515_v48, %v7580_v22  ;;  %v2647_v43 = vsub.f32 %v6517_v0, %v7581_v33  ;;  %v7584_v54 = vand.u32 4294901760, %v6522_v59 }
 0x1fd   : > { %7898 = vst [vmem:[#allocation122_spill] sm:$0xff] %v6777_v15  ;;  %v3527_v28 = vand.u32 4294901760, %v3526_v55  ;;  %v3520_v14 = vsub.f32 %v6520_v36, %v7583_v41  ;;  %v7588_v10 = vand.u32 4294901760, %v6524_v62  ;;  %v7585_v32 = vand.u32 4294901760, %v6526_v21 }
 0x1fe   : > { %7899 = vst [vmem:[#allocation123_spill] sm:$0xff] %v6783_v9  ;;  %v2636_v51 = vand.u32 4294901760, %v2635_v56  ;;  %v2648_v35 = vand.u32 4294901760, %v2647_v43  ;;  %v3532_v22 = vsub.f32 %v6522_v59, %v7584_v54  ;;  %v7586_v15 = vand.u32 4294901760, %v6528_v50 }
 0x1ff   : > { %v6802_v31 = vpack.c.bf16 %v3527_v28, %v3515_v11  ;;  %v3521_v55 = vand.u32 4294901760, %v3520_v14  ;;  %v2641_v41 = vsub.f32 %v6524_v62, %v7588_v10  ;;  %v2653_v9 = vsub.f32 %v6526_v21, %v7585_v32  ;;  %v7904_v10 = vld [vmem:[#allocation46_spill] sm:$0xff]  ;;  %v7914_v11 = vld [vmem:[#allocation56_spill] sm:$0xff] }
 0x200   : > { %v6810_v56 = vpack.c.bf16 %v2648_v35, %v2636_v51  ;;  %v3533_v43 = vand.u32 4294901760, %v3532_v22  ;;  %v7587_v54 = vand.u32 4294901760, %v6530_v58  ;;  %v7589_v28 = vand.u32 4294901760, %v6534_v47 }
 0x201   : > { %v2642_v40 = vand.u32 4294901760, %v2641_v41  ;;  %v2654_v33 = vand.u32 4294901760, %v2653_v9  ;;  %v2659_v32 = vsub.f32 %v6528_v50, %v7586_v15  ;;  %v7590_v22 = vand.u32 4294901760, %v6536_v39  ;;  %v7908_v9 = vld [vmem:[#allocation50_spill] sm:$0xff] }
 0x202   : > { %v6817_v14 = vpack.c.bf16 %v3533_v43, %v3521_v55  ;;  %v2671_v35 = vsub.f32 %v6530_v58, %v7587_v54  ;;  %v2665_v41 = vsub.f32 %v6534_v47, %v7589_v28  ;;  %v7906_v28 = vld [vmem:[#allocation48_spill] sm:$0xff] }
 0x203   : > { %v6826_v51 = vpack.c.bf16 %v2654_v33, %v2642_v40  ;;  %v2660_v43 = vand.u32 4294901760, %v2659_v32  ;;  %v2677_v54 = vsub.f32 %v6536_v39, %v7590_v22  ;;  %v7913_v22 = vld [vmem:[#allocation55_spill] sm:$0xff]  ;;  %v7922_v39 = vmov 0.0   ;;  %v7924_v58 = vld [vmem:[#allocation32_spill] sm:$0xff] }
 0x204   : > { %v2672_v15 = vand.u32 4294901760, %v2671_v35  ;;  %v2666_v40 = vand.u32 4294901760, %v2665_v41  ;;  %v7902_v41 = vld [vmem:[#allocation44_spill] sm:$0xff] }
 0x205   : > { %v2678_v32 = vand.u32 4294901760, %v2677_v54  ;;  %v7909_v54 = vld [vmem:[#allocation51_spill] sm:$0xff] }
 0x206   : > { %v6846_v55 = vpack.c.bf16 %v2672_v15, %v2660_v43 }
 0x207   : > { %v6860_v43 = vpack.c.bf16 %v2678_v32, %v2666_v40  ;;  %v7916_v40 = vld [vmem:[#allocation63_spill] sm:$0xff] }
 0x285   : > { %v1409_v16 = vpop.f32.mrb[0].mxu0 }
 0x286   : > { %v6898_v18 = vand.u32 4294901760, %v1409_v16  ;;  %v4431_v57 = vpop.f32.mrb[1].mxu0 }
 0x287   : > { %v7921_v57 = vld [vmem:[#allocation107_spill] sm:$0xff] }
 0x288   : > { %7918 = vst [vmem:[#allocation44_spill] sm:$0xff] %v6898_v18  ;;  %v6901_v15 = vsub.f32 %v1409_v16, %v6898_v18 }
 0x28a   : > { %v7617_v32 = vand.u32 4294901760, %v6901_v15  ;;  %v2310_v48 = vpop.f32.mrb[0].mxu1 }
 0x28b   : > { %v6904_v35 = vand.u32 4294901760, %v2310_v48  ;;  %v4491_v36 = vpop.f32.mrb[1].mxu1 }
 0x28c   : > { %v3335_v33 = vsub.f32 %v6901_v15, %v7617_v32  ;;  %v7923_v36 = vld [vmem:[#allocation30_spill] sm:$0xff]  ;;  %v7927_v32 = vld [vmem:[#allocation109_spill] sm:$0xff] }
 0x28d   : > { %7919 = vst [vmem:[#allocation45_spill] sm:$0xff] %v6904_v35  ;;  %v6910_v13 = vsub.f32 %v2310_v48, %v6904_v35  ;;  %v7925_v48 = vld [vmem:[#allocation108_spill] sm:$0xff] }
 0x28e   : > { %v3336_v60 = vand.u32 4294901760, %v3335_v33  ;;  %v7926_v33 = vld [vmem:[#allocation38_spill] sm:$0xff] }
 0x28f   : > { %7920 = vst [vmem:[#allocation46_spill] sm:$0xff] %v6910_v13  ;;  %v7618_v47 = vand.u32 4294901760, %v6910_v13 }
 0x290   : > { %3337 = vmatmul.mubr.f32.vlgmr.msra.gmra.mrb[2].mxu0 %v3336_v60  ;;  %v7928_v60 = vld [vmem:[#allocation110_spill] sm:$0xff] }
 0x291   : > { %v2480_v16 = vsub.f32 %v6910_v13, %v7618_v47  ;;  %4719 = vmatpush1.bf16.msra.mxu0 %v7921_v57  ;;  %3567 = vmatprep.mubr.f32.mxu0 %v7922_v39  ;;  %v7929_v47 = vld [vmem:[#allocation111_spill] sm:$0xff]  ;;  %v7930_v57 = vld [vmem:[#allocation112_spill] sm:$0xff]  ;;  %v7931_v13 = vld [vmem:[#allocation113_spill] sm:$0xff] }
 0x292   : > { %4721 = vmatprep.subr.bf16.mxu0 %v7923_v36  ;;  %v7935_v36 = vld [vmem:[#allocation59_spill] sm:$0xff] }
 0x293   : > { %v2481_v50 = vand.u32 4294901760, %v2480_v16  ;;  %v7932_v16 = vld [vmem:[#allocation114_spill] sm:$0xff] }
 0x295   : > { %4723 = vmatpush1.bf16.msra.mxu0 %v7924_v58  ;;  %2482 = vmatmul.mubr.f32.vlgmr.msra.gmra.mrb[2].mxu1 %v2481_v50  ;;  %v7933_v58 = vld [vmem:[#allocation115_spill] sm:$0xff]  ;;  %v7934_v50 = vld [vmem:[#allocation58_spill] sm:$0xff] }
 0x296   : > { %4527 = vmatpush1.bf16.msra.mxu1 %v7925_v48  ;;  %4725 = vmatprep.subr.bf16.mxu0 %v7926_v33  ;;  %v7936_v48 = vld [vmem:[#allocation60_spill] sm:$0xff] }
 0x297   : > { %4529 = vmatprep.subr.bf16.mxu1 %v7927_v32  ;;  %2712 = vmatprep.mubr.f32.mxu1 %v7922_v39  ;;  %v7937_v32 = vld [vmem:[#allocation61_spill] sm:$0xff]  ;;  %v7938_v33 = vld [vmem:[#allocation116_spill] sm:$0xff] }
 0x299   : > { %4727 = vmatpush1.bf16.msra.mxu0 %v7928_v60  ;;  %v7939_v60 = vld [vmem:[#allocation117_spill] sm:$0xff] }
 0x29a   : > { %4531 = vmatpush1.bf16.msra.mxu1 %v7929_v47  ;;  %4729 = vmatprep.subr.bf16.mxu0 %v7930_v57  ;;  %v7940_v47 = vld [vmem:[#allocation118_spill] sm:$0xff]  ;;  %v7941_v57 = vld [vmem:[#allocation119_spill] sm:$0xff] }
 0x29b   : > { %4533 = vmatprep.subr.bf16.mxu1 %v7931_v13  ;;  %v7942_v13 = vld [vmem:[#allocation120_spill] sm:$0xff] }
 0x29d   : > { %4731 = vmatpush1.bf16.msra.mxu0 %v7932_v16  ;;  %v7943_v16 = vld [vmem:[#allocation121_spill] sm:$0xff] }
 0x29e   : > { %4535 = vmatpush1.bf16.msra.mxu1 %v7933_v58  ;;  %4733 = vmatprep.subr.bf16.mxu0 %v7934_v50  ;;  %v7944_v58 = vld [vmem:[#allocation122_spill] sm:$0xff]  ;;  %v7945_v50 = vld [vmem:[#allocation123_spill] sm:$0xff] }
 0x29f   : > { %4537 = vmatprep.subr.bf16.mxu1 %v7935_v36  ;;  %v7946_v36 = vpack.c.bf16 %v7811_v49, %v7810_v27 }
 0x2a1   : > { %4735 = vmatpush1.bf16.msra.mxu0 %v7936_v48  ;;  %v7947_v48 = vpack.c.bf16 %v7815_v37, %v7812_v63 }
 0x2a2   : > { %4539 = vmatpush1.bf16.msra.mxu1 %v7937_v32  ;;  %4737 = vmatprep.subr.bf16.mxu0 %v7938_v33  ;;  %v2379_v32 = vld [vmem:[%s7953_s6] sm:$0xff]  ;;  %v7954_v33 = vld [vmem:[#allocation34_spill] sm:$0xff]  ;;  %s4122_s6 = sadd.s32 %s4320_s11, %s4312_s15 }
 0x2a3   : > { %4541 = vmatprep.subr.bf16.mxu1 %v7939_v60  ;;  %4092 = vperm.xlu1 %5102, %v2379_v32   ;;  %v7972_v32 = vld [vmem:[#allocation49_spill] sm:$0xff]  ;;  %s4321_s22 = sshll.u32 %s4122_s6, 7 }
 0x2a4   : > { %s7272_s27 = scalar_lea.hbm %s8145_s10, %s4321_s22 }
 0x2a5   : > { %4739 = vmatpush1.bf16.msra.mxu0 %v7940_v47  ;;  %v7957_v47 = vld [vmem:[#allocation36_spill] sm:$0xff] }
 0x2a6   : > { %4543 = vmatpush1.bf16.msra.mxu1 %v7941_v57  ;;  %4741 = vmatprep.subr.bf16.mxu0 %v7942_v13  ;;  %v7958_v57 = vld [vmem:[#allocation35_spill] sm:$0xff] }
 0x2a7   : > { %4545 = vmatprep.subr.bf16.mxu1 %v7943_v16  ;;  %v7959_v13 = vpack.c.bf16 %v7957_v47, %v7958_v57  ;;  %v7960_v16 = vld [vmem:[#allocation37_spill] sm:$0xff] }
 0x2a9   : > { %4743 = vmatpush1.bf16.msra.mxu0 %v7944_v58  ;;  %v7961_v58 = vpack.c.bf16 %v7853_v12, %v7960_v16 }
 0x2aa   : > { %4547 = vmatpush1.bf16.msra.mxu1 %v7945_v50  ;;  %4745 = vmatprep.subr.bf16.mxu0 %v6802_v31  ;;  %v7948_v31 = vpack.c.bf16 %v7828_v29, %v7816_v4  ;;  %v7962_v50 = vld [vmem:[#allocation40_spill] sm:$0xff] }
 0x2ab   : > { %4549 = vmatprep.subr.bf16.mxu1 %v6810_v56  ;;  %v7949_v56 = vld [vmem:[#allocation29_spill] sm:$0xff] }
 0x2ad   : > { %4747 = vmatpush1.bf16.msra.mxu0 %v6817_v14  ;;  %v7950_v14 = vpack.c.bf16 %v7842_v6, %v7949_v56 }
 0x2ae   : > { %4551 = vmatpush1.bf16.msra.mxu1 %v6826_v51  ;;  %4749 = vmatprep.subr.bf16.mxu0 %v7946_v36  ;;  %v7951_v51 = vld [vmem:[#allocation31_spill] sm:$0xff] }
 0x2af   : > { %4553 = vmatprep.subr.bf16.mxu1 %v6846_v55  ;;  %v7952_v55 = vpack.c.bf16 %v7844_v46, %v7951_v51  ;;  %v7963_v36 = vld [vmem:[#allocation39_spill] sm:$0xff] }
 0x2b0   : > { %3569 = vmatmul.mubr.f32.vlgmr.msra.gmra.mrb[2].mxu0 %v6898_v18  ;;  %v7973_v18 = vpack.c.bf16 %v7908_v9, %v7972_v32 }
 0x2b1   : > { %4751 = vmatpush1.bf16.msra.mxu0 %v7947_v48  ;;  %3703 = vmatprep.mubr.f32.mxu0 %v7922_v39  ;;  %v7964_v48 = vpack.c.bf16 %v7962_v50, %v7963_v36 }
 0x2b2   : > { %4555 = vmatpush1.bf16.msra.mxu1 %v6860_v43  ;;  %4753 = vmatprep.subr.bf16.mxu0 %v7948_v31  ;;  %v7955_v43 = vld [vmem:[#allocation33_spill] sm:$0xff]  ;;  %v7965_v31 = vld [vmem:[#allocation42_spill] sm:$0xff] }
 0x2b3   : > { %4557 = vmatprep.subr.bf16.mxu1 %v7950_v14  ;;  %v7956_v60 = vpack.c.bf16 %v7954_v33, %v7955_v43  ;;  %v7966_v14 = vld [vmem:[#allocation41_spill] sm:$0xff] }
 0x2b5   : > { %2714 = vmatmul.mubr.f32.vlgmr.msra.gmra.mrb[2].mxu1 %v6904_v35  ;;  %4755 = vmatpush1.bf16.msra.mxu0 %v7952_v55  ;;  %v7967_v55 = vpack.c.bf16 %v7965_v31, %v7966_v14 }
 0x2b6   : > { %4559 = vmatpush1.bf16.msra.mxu1 %v7956_v60  ;;  %4757 = vmatprep.subr.bf16.mxu0 %v7959_v13  ;;  %v7968_v60 = vld [vmem:[#allocation43_spill] sm:$0xff]  ;;  %v7970_v13 = vpack.c.bf16 %v7904_v10, %v7903_v8 }
 0x2b7   : > { %4561 = vmatprep.subr.bf16.mxu1 %v7961_v58  ;;  %2848 = vmatprep.mubr.f32.mxu1 %v7922_v39  ;;  %v7969_v35 = vpack.c.bf16 %v7902_v41, %v7968_v60  ;;  %v7971_v58 = vpack.c.bf16 %v7906_v28, %v7905_v61 }
 0x2b9   : > { %4759 = vmatpush1.bf16.msra.mxu0 %v7964_v48  ;;  %v7974_v48 = vpack.c.bf16 %v7910_v44, %v7909_v54 }
 0x2ba   : > { %4563 = vmatpush1.bf16.msra.mxu1 %v7967_v55  ;;  %4761 = vmatprep.subr.bf16.mxu0 %v7969_v35  ;;  %v7975_v55 = vpack.c.bf16 %v7912_v3, %v7911_v17  ;;  %v7976_v35 = vpack.c.bf16 %v7914_v11, %v7913_v22 }
 0x2bb   : > { %4565 = vmatprep.subr.bf16.mxu1 %v7970_v13  ;;  %v7977_v13 = vpack.c.bf16 %v7881_v23, %v7915_v53 }
 0x2bd   : > { %4763 = vmatpush1.bf16.msra.mxu0 %v7971_v58  ;;  %v7978_v58 = vpack.c.bf16 %v7885_v25, %v7882_v45 }
 0x2be   : > { %4567 = vmatpush1.bf16.msra.mxu1 %v7973_v18  ;;  %4765 = vmatprep.subr.bf16.mxu0 %v7974_v48  ;;  %v7979_v18 = vpack.c.bf16 %v7887_v5, %v7886_v20  ;;  %v7980_v48 = vpack.c.bf16 %v7891_v1, %v7916_v40 }
 0x2bf   : > { %4569 = vmatprep.subr.bf16.mxu1 %v7975_v55  ;;  %v7981_v55 = vpack.c.bf16 %v6477_v34, %v7917_v52 }
 0x2c1   : > { %4767 = vmatpush1.bf16.msra.mxu0 %v7976_v35  ;;  %v7982_v35 = vpack.c.bf16 %v6481_v26, %v6479_v7 }
 0x2c2   : > { %4571 = vmatpush1.bf16.msra.mxu1 %v7977_v13  ;;  %4769 = vmatprep.subr.bf16.mxu0 %v7978_v58  ;;  %v7983_v13 = vpack.c.bf16 %v6486_v2, %v6484_v38  ;;  %v7984_v58 = vld [vmem:[#allocation93_spill] sm:$0xff] }
 0x2c3   : > { %4573 = vmatprep.subr.bf16.mxu1 %v7979_v18  ;;  %v7985_v5 = vpack.c.bf16 %v6490_v24, %v7984_v58  ;;  %v7986_v18 = vld [vmem:[#allocation94_spill] sm:$0xff] }
 0x2c4   : > { %v7987_v1 = vpack.c.bf16 %v6495_v19, %v7986_v18  ;;  %v7995_v19 = vld [vmem:[#allocation103_spill] sm:$0xff] }
 0x2c5   : > { %4771 = vmatpush1.bf16.msra.mxu0 %v7980_v48  ;;  %v7988_v48 = vpack.c.bf16 %v6513_v42, %v6510_v30 }
 0x2c6   : > { %4575 = vmatpush1.bf16.msra.mxu1 %v7981_v55  ;;  %4773 = vmatprep.subr.bf16.mxu0 %v7982_v35  ;;  %v7989_v55 = vld [vmem:[#allocation28_spill] sm:$0xff]  ;;  %v7991_v35 = vld [vmem:[#allocation98_spill] sm:$0xff] }
 0x2c7   : > { %4577 = vmatprep.subr.bf16.mxu1 %v7983_v13  ;;  %v7990_v26 = vpack.c.bf16 %v6517_v0, %v7989_v55  ;;  %v7992_v2 = vpack.c.bf16 %v6522_v59, %v7991_v35  ;;  %v7993_v13 = vpack.c.bf16 %v6526_v21, %v6524_v62  ;;  %v8000_v0 = vld [vmem:[#allocation105_spill] sm:$0xff]  ;;  %v8003_v21 = vld [vmem:[#allocation66_spill] sm:$0xff]  ;;  %v8019_v62 = vld [vmem:[#allocation83_spill] sm:$0xff] }
 0x2c8   : > { %v8034_v35 = vld [vmem:[#allocation24_spill] sm:$0xff] }
 0x2c9   : > { %4775 = vmatpush1.bf16.msra.mxu0 %v7985_v5  ;;  %v7994_v5 = vld [vmem:[#allocation65_spill] sm:$0xff] }
 0x2ca   : > { %4579 = vmatpush1.bf16.msra.mxu1 %v7987_v1  ;;  %4777 = vmatprep.subr.bf16.mxu0 %v7988_v48  ;;  %v7996_v1 = vld [vmem:[#allocation102_spill] sm:$0xff]  ;;  %v7998_v48 = vld [vmem:[#allocation67_spill] sm:$0xff] }
 0x2cb   : > { %4581 = vmatprep.subr.bf16.mxu1 %v7990_v26  ;;  %v7997_v18 = vpack.c.bf16 %v7995_v19, %v7996_v1  ;;  %v7999_v26 = vld [vmem:[#allocation106_spill] sm:$0xff]  ;;  %v8008_v1 = vld [vmem:[#allocation72_spill] sm:$0xff] }
 0x2cc   : > { %v8001_v59 = vpack.c.bf16 %v7999_v26, %v8000_v0  ;;  %v8006_v19 = vld [vmem:[#allocation70_spill] sm:$0xff] }
 0x2cd   : > { %4779 = vmatpush1.bf16.msra.mxu0 %v7992_v2  ;;  %v8002_v2 = vld [vmem:[#allocation68_spill] sm:$0xff]  ;;  %v8010_v26 = vld [vmem:[#allocation74_spill] sm:$0xff] }
 0x2ce   : > { %4583 = vmatpush1.bf16.msra.mxu1 %v7993_v13  ;;  %4781 = vmatprep.subr.bf16.mxu0 %v7994_v5  ;;  %v8004_v13 = vld [vmem:[#allocation46_spill] sm:$0xff]  ;;  %v8005_v5 = vld [vmem:[#allocation69_spill] sm:$0xff] }
 0x2cf   : > { %4585 = vmatprep.subr.bf16.mxu1 %v7997_v18  ;;  %v8007_v18 = vld [vmem:[#allocation71_spill] sm:$0xff]  ;;  %v8014_v0 = vld [vmem:[#allocation78_spill] sm:$0xff] }
 0x2d0   : > { %3706 = vmatmul.mubr.f32.vlgmr.msra.gmra.mrb[2].mxu0 %v6901_v15 }
 0x2d1   : > { %4783 = vmatpush1.bf16.msra.mxu0 %v7998_v48  ;;  %3808 = vmatprep.mubr.f32.mxu0 %v7922_v39  ;;  %v8009_v48 = vld [vmem:[#allocation73_spill] sm:$0xff] }
 0x2d2   : > { %4587 = vmatpush1.bf16.msra.mxu1 %v8001_v59  ;;  %4785 = vmatprep.subr.bf16.mxu0 %v8002_v2  ;;  %v8011_v59 = vld [vmem:[#allocation75_spill] sm:$0xff]  ;;  %v8012_v2 = vld [vmem:[#allocation76_spill] sm:$0xff] }
 0x2d3   : > { %4589 = vmatprep.subr.bf16.mxu1 %v8003_v21  ;;  %v8013_v21 = vld [vmem:[#allocation77_spill] sm:$0xff] }
 0x2d5   : > { %2851 = vmatmul.mubr.f32.vlgmr.msra.gmra.mrb[2].mxu1 %v8004_v13  ;;  %4787 = vmatpush1.bf16.msra.mxu0 %v8005_v5  ;;  %v8015_v5 = vld [vmem:[#allocation79_spill] sm:$0xff] }
 0x2d6   : > { %4591 = vmatpush1.bf16.msra.mxu1 %v8006_v19  ;;  %4789 = vmatprep.subr.bf16.mxu0 %v8007_v18  ;;  %v8016_v19 = vld [vmem:[#allocation80_spill] sm:$0xff]  ;;  %v8017_v18 = vld [vmem:[#allocation81_spill] sm:$0xff] }
 0x2d7   : > { %4593 = vmatprep.subr.bf16.mxu1 %v8008_v1  ;;  %2953 = vmatprep.mubr.f32.mxu1 %v7922_v39  ;;  %v8018_v1 = vld [vmem:[#allocation82_spill] sm:$0xff] }
 0x2d9   : > { %4791 = vmatpush1.bf16.msra.mxu0 %v8009_v48  ;;  %v8020_v48 = vld [vmem:[#allocation84_spill] sm:$0xff] }
 0x2da   : > { %4595 = vmatpush1.bf16.msra.mxu1 %v8010_v26  ;;  %4793 = vmatprep.subr.bf16.mxu0 %v8011_v59  ;;  %v8021_v26 = vld [vmem:[#allocation85_spill] sm:$0xff]  ;;  %v8022_v59 = vld [vmem:[#allocation86_spill] sm:$0xff] }
 0x2db   : > { %4597 = vmatprep.subr.bf16.mxu1 %v8012_v2  ;;  %v8023_v2 = vld [vmem:[#allocation87_spill] sm:$0xff] }
 0x2dd   : > { %4795 = vmatpush1.bf16.msra.mxu0 %v8013_v21  ;;  %v8024_v21 = vld [vmem:[#allocation88_spill] sm:$0xff] }
 0x2de   : > { %4599 = vmatpush1.bf16.msra.mxu1 %v8014_v0  ;;  %4797 = vmatprep.subr.bf16.mxu0 %v8015_v5  ;;  %v8025_v0 = vld [vmem:[#allocation89_spill] sm:$0xff]  ;;  %v8026_v5 = vld [vmem:[#allocation90_spill] sm:$0xff] }
 0x2df   : > { %4601 = vmatprep.subr.bf16.mxu1 %v8016_v19  ;;  %v8027_v19 = vld [vmem:[#allocation91_spill] sm:$0xff] }
 0x2e1   : > { %4799 = vmatpush1.bf16.msra.mxu0 %v8017_v18 }
 0x2e2   : > { %4603 = vmatpush1.bf16.msra.mxu1 %v8018_v1  ;;  %4801 = vmatprep.subr.bf16.mxu0 %v8019_v62  ;;  %v8028_v1 = vand.u32 4294901760, %v7810_v27  ;;  %v8029_v62 = vand.u32 4294901760, %v7811_v49  ;;  %v8038_v49 = vand.u32 4294901760, %v7949_v56  ;;  %v8046_v56 = vand.u32 4294901760, %v7958_v57 }
 0x2e3   : > { %4605 = vmatprep.subr.bf16.mxu1 %v8020_v48  ;;  %v8030_v48 = vld [vmem:[#allocation92_spill] sm:$0xff]  ;;  %v8054_v57 = vand.u32 4294901760, %v7965_v31 }
 0x2e4   : > { %v4812_v18 = vpack.c.bf16 %v8029_v62, %v8028_v1  ;;  %v8039_v62 = vand.u32 4294901760, %v7842_v6 }
 0x2e5   : > { %4803 = vmatpush1.bf16.msra.mxu0 %v8021_v26  ;;  %v8031_v26 = vld [vmem:[#allocation23_spill] sm:$0xff] }
 0x2e6   : > { %4607 = vmatpush1.bf16.msra.mxu1 %v8022_v59  ;;  %4805 = vmatprep.subr.bf16.mxu0 %v8023_v2  ;;  %v8032_v59 = vand.u32 4294901760, %v7812_v63  ;;  %v8033_v2 = vand.u32 4294901760, %v7815_v37  ;;  %v4620_v1 = vpack.c.bf16 %v8039_v62, %v8038_v49  ;;  %v8040_v63 = vand.u32 4294901760, %v6901_v15 }
 0x2e7   : > { %4609 = vmatprep.subr.bf16.mxu1 %v8024_v21  ;;  %v8041_v37 = vand.u32 4294901760, %v7951_v51  ;;  %v8047_v15 = vand.u32 4294901760, %v7957_v47  ;;  %v8048_v51 = vand.u32 4294901760, %v7960_v16  ;;  %v8053_v47 = vand.u32 4294901760, %v7966_v14 }
 0x2e8   : > { %v4814_v21 = vpack.c.bf16 %v8033_v2, %v8032_v59  ;;  %v8042_v2 = vand.u32 4294901760, %v7844_v46  ;;  %v8049_v46 = vand.u32 4294901760, %v7853_v12  ;;  %v8050_v59 = vand.u32 4294901760, %v8004_v13 }
 0x2e9   : > { %4807 = vmatpush1.bf16.msra.mxu0 %v8025_v0  ;;  %v8037_v0 = vld [vmem:[#allocation96_spill] sm:$0xff]  ;;  %v4626_v49 = vpack.c.bf16 %v8054_v57, %v8053_v47  ;;  %v8055_v16 = vand.u32 4294901760, %v7968_v60  ;;  %v8056_v12 = vand.u32 4294901760, %v7902_v41  ;;  %v8057_v13 = vand.u32 4294901760, %v7903_v8 }
 0x2ea   : > { %4611 = vmatpush1.bf16.msra.mxu1 %v8026_v5  ;;  %4809 = vmatprep.subr.bf16.mxu0 %v8027_v19  ;;  %v8035_v5 = vand.u32 4294901760, %v7816_v4  ;;  %v8036_v19 = vand.u32 4294901760, %v7828_v29  ;;  %v8043_v4 = vld [vmem:[#allocation104_spill] sm:$0xff]  ;;  %v8045_v29 = vand.u32 4294901760, %v7954_v33  ;;  %v8052_v33 = vand.u32 4294901760, %v7962_v50 }
 0x2eb   : > { %4613 = vmatprep.subr.bf16.mxu1 %v8030_v48  ;;  %v4824_v62 = vpack.c.bf16 %v8056_v12, %v8055_v16  ;;  %v8059_v50 = vand.u32 4294901760, %v7905_v61  ;;  %v8060_v14 = vand.u32 4294901760, %v7906_v28  ;;  %v8061_v60 = vand.u32 4294901760, %v7972_v32 }
 0x2ec   : > { %v4816_v27 = vpack.c.bf16 %v8036_v19, %v8035_v5  ;;  %v8044_v19 = vand.u32 4294901760, %v7955_v43  ;;  %v4624_v5 = vpack.c.bf16 %v8049_v46, %v8048_v51  ;;  %v8051_v43 = vand.u32 4294901760, %v7963_v36 }
 0x2ed   : > { %4811 = vmatpush1.bf16.msra.mxu0 %v8031_v26  ;;  %v8058_v36 = vand.u32 4294901760, %v7904_v10  ;;  %v4826_v31 = vpack.c.bf16 %v8060_v14, %v8059_v50  ;;  %v8062_v41 = vand.u32 4294901760, %v7908_v9  ;;  %v8063_v8 = vand.u32 4294901760, %v7909_v54 }
 0x2ee   : > { %4615 = vmatpush1.bf16.msra.mxu1 %v8034_v35  ;;  %4813 = vmatprep.subr.bf16.mxu0 %v4812_v18  ;;  %v4818_v18 = vpack.c.bf16 %v8042_v2, %v8041_v37  ;;  %v4622_v6 = vpack.c.bf16 %v8045_v29, %v8044_v19  ;;  %v8064_v10 = vand.u32 4294901760, %v7910_v44  ;;  %v8065_v2 = vand.u32 4294901760, %v7911_v17 }
 0x2ef   : > { %4617 = vmatprep.subr.bf16.mxu1 %v8037_v0  ;;  %v8066_v61 = vand.u32 4294901760, %v7912_v3  ;;  %v8067_v28 = vand.u32 4294901760, %v7913_v22  ;;  %v8068_v19 = vand.u32 4294901760, %v7914_v11  ;;  %v8069_v9 = vand.u32 4294901760, %v7915_v53 }
 0x2f0   : > { %3812 = vmatmul.mubr.f32.vlgmr.msra.gmra.mrb[2].mxu0 %v8040_v63  ;;  %v4630_v63 = vpack.c.bf16 %v8062_v41, %v8061_v60  ;;  %v4828_v37 = vpack.c.bf16 %v8064_v10, %v8063_v8  ;;  %v8070_v54 = vand.u32 4294901760, %v7881_v23  ;;  %v8071_v29 = vand.u32 4294901760, %v7882_v45 }
 0x2f1   : > { %4815 = vmatpush1.bf16.msra.mxu0 %v4814_v21  ;;  %3978 = vmatprep.mubr.f32.mxu0 %v7922_v39  ;;  %v4820_v21 = vpack.c.bf16 %v8047_v15, %v8046_v56  ;;  %v4830_v32 = vpack.c.bf16 %v8068_v19, %v8067_v28  ;;  %v8072_v17 = vand.u32 4294901760, %v7885_v25  ;;  %v8073_v3 = vand.u32 4294901760, %v7886_v20  ;;  %v8074_v56 = vld [vmem:[#allocation62_spill] sm:$0xff]  ;;  %v8110_v28 = vld [vmem:[#allocation65_spill] sm:$0xff] }
 0x2f2   : > { %4619 = vmatpush1.bf16.msra.mxu1 %v8043_v4  ;;  %4817 = vmatprep.subr.bf16.mxu0 %v4816_v27  ;;  %v4822_v27 = vpack.c.bf16 %v8052_v33, %v8051_v43  ;;  %v4634_v44 = vpack.c.bf16 %v8070_v54, %v8069_v9  ;;  %v8075_v22 = vand.u32 4294901760, %v8074_v56  ;;  %v8076_v11 = vand.u32 4294901760, %v7916_v40  ;;  %v8085_v33 = vld [vmem:[#allocation27_spill] sm:$0xff]  ;;  %v8111_v19 = vld [vmem:[#allocation105_spill] sm:$0xff]  ;;  %v8113_v9 = vld [vmem:[#allocation106_spill] sm:$0xff] }
 0x2f3   : > { %4621 = vmatprep.subr.bf16.mxu1 %v4620_v1  ;;  %v4628_v1 = vpack.c.bf16 %v8058_v36, %v8057_v13  ;;  %v8079_v23 = vand.u32 4294901760, %v7917_v52  ;;  %v8080_v45 = vand.u32 4294901760, %v6477_v34  ;;  %v8081_v46 = vand.u32 4294901760, %v6479_v7  ;;  %v8089_v34 = vld [vmem:[#allocation94_spill] sm:$0xff]  ;;  %v8091_v7 = vld [vmem:[#allocation95_spill] sm:$0xff]  ;;  %v8119_v56 = vld [vmem:[#allocation45_spill] sm:$0xff] }
 0x2f4   : > { %v4636_v15 = vpack.c.bf16 %v8075_v22, %v8073_v3  ;;  %v8084_v43 = vand.u32 4294901760, %v6484_v38  ;;  %v8086_v40 = vand.u32 4294901760, %v8085_v33  ;;  %v8087_v47 = vand.u32 4294901760, %v7984_v58  ;;  %v8118_v3 = vld [vmem:[#allocation66_spill] sm:$0xff]  ;;  %v8120_v22 = vld [vmem:[#allocation69_spill] sm:$0xff]  ;;  %v8135_v33 = vld [vmem:[#allocation84_spill] sm:$0xff] }
 0x2f5   : > { %2957 = vmatmul.mubr.f32.vlgmr.msra.gmra.mrb[2].mxu1 %v8050_v59  ;;  %4819 = vmatpush1.bf16.msra.mxu0 %v4818_v18  ;;  %v4632_v18 = vpack.c.bf16 %v8066_v61, %v8065_v2  ;;  %v4638_v25 = vpack.c.bf16 %v8080_v45, %v8079_v23  ;;  %v8088_v57 = vand.u32 4294901760, %v6490_v24  ;;  %v8092_v16 = vand.u32 4294901760, %v8091_v7  ;;  %v8098_v24 = vld [vmem:[#allocation98_spill] sm:$0xff]  ;;  %v8126_v23 = vld [vmem:[#allocation75_spill] sm:$0xff]  ;;  %v8127_v45 = vld [vmem:[#allocation76_spill] sm:$0xff] }
 0x2f6   : > { %4623 = vmatpush1.bf16.msra.mxu1 %v4622_v6  ;;  %4821 = vmatprep.subr.bf16.mxu0 %v4820_v21  ;;  %v4832_v6 = vpack.c.bf16 %v8072_v17, %v8071_v29  ;;  %v8077_v21 = vld [vmem:[#allocation64_spill] sm:$0xff]  ;;  %v8094_v38 = vand.u32 4294901760, %v6513_v42  ;;  %v8095_v36 = vand.u32 4294901760, %v7989_v55  ;;  %v8099_v14 = vand.u32 4294901760, %v8098_v24  ;;  %v8108_v55 = vld [vmem:[#allocation103_spill] sm:$0xff] }
 0x2f7   : > { %4625 = vmatprep.subr.bf16.mxu1 %v4624_v5  ;;  %3123 = vmatprep.mubr.f32.mxu1 %v7922_v39  ;;  %v8078_v51 = vand.u32 4294901760, %v8077_v21  ;;  %v8082_v5 = vld [vmem:[#allocation26_spill] sm:$0xff]  ;;  %v4838_v52 = vpack.c.bf16 %v8088_v57, %v8087_v47  ;;  %v8109_v61 = vand.u32 4294901760, %v8108_v55  ;;  %v8114_v54 = vand.u32 4294901760, %v8113_v9  ;;  %v8115_v29 = vld [vmem:[#allocation44_spill] sm:$0xff]  ;;  %v8116_v17 = vld [vmem:[#allocation67_spill] sm:$0xff] }
 0x2f8   : > { %v8083_v20 = vand.u32 4294901760, %v8082_v5  ;;  %v8123_v21 = vld [vmem:[#allocation72_spill] sm:$0xff]  ;;  %v8130_v5 = vld [vmem:[#allocation79_spill] sm:$0xff] }
 0x2f9   : > { %4823 = vmatpush1.bf16.msra.mxu0 %v4822_v27  ;;  %v4834_v53 = vpack.c.bf16 %v8078_v51, %v8076_v11  ;;  %v4640_v27 = vpack.c.bf16 %v8086_v40, %v8084_v43  ;;  %v8122_v11 = vld [vmem:[#allocation71_spill] sm:$0xff]  ;;  %v8124_v51 = vld [vmem:[#allocation73_spill] sm:$0xff]  ;;  %v8133_v43 = vld [vmem:[#allocation82_spill] sm:$0xff] }
 0x2fa   : > { %4627 = vmatpush1.bf16.msra.mxu1 %v4626_v49  ;;  %4825 = vmatprep.subr.bf16.mxu0 %v4824_v62  ;;  %v4836_v59 = vpack.c.bf16 %v8083_v20, %v8081_v46  ;;  %v8090_v49 = vand.u32 4294901760, %v8089_v34  ;;  %v8093_v62 = vand.u32 4294901760, %v6510_v30  ;;  %v8104_v30 = vld [vmem:[#allocation101_spill] sm:$0xff]  ;;  %v8129_v46 = vld [vmem:[#allocation78_spill] sm:$0xff]  ;;  %v8131_v20 = vld [vmem:[#allocation80_spill] sm:$0xff] }
 0x2fb   : > { %4629 = vmatprep.subr.bf16.mxu1 %v4628_v1  ;;  %v8096_v1 = vld [vmem:[#allocation97_spill] sm:$0xff]  ;;  %v8105_v10 = vand.u32 4294901760, %v8104_v30  ;;  %v8139_v47 = vld [vmem:[#allocation87_spill] sm:$0xff]  ;;  %v8140_v57 = vld [vmem:[#allocation88_spill] sm:$0xff] }
 0x2fc   : > { %v4642_v12 = vpack.c.bf16 %v8092_v16, %v8090_v49  ;;  %v4840_v13 = vpack.c.bf16 %v8094_v38, %v8093_v62  ;;  %v8097_v58 = vand.u32 4294901760, %v8096_v1  ;;  %v8136_v40 = vld [vmem:[#allocation85_spill] sm:$0xff]  ;;  %v8142_v34 = vld [vmem:[#allocation90_spill] sm:$0xff]  ;;  %v8143_v49 = vld [vmem:[#allocation91_spill] sm:$0xff] }
 0x2fd   : > { %4827 = vmatpush1.bf16.msra.mxu0 %v4826_v31  ;;  %v8100_v31 = vld [vmem:[#allocation99_spill] sm:$0xff] }
 0x2fe   : > { %4631 = vmatpush1.bf16.msra.mxu1 %v4630_v63  ;;  %4829 = vmatprep.subr.bf16.mxu0 %v4828_v37  ;;  %v4644_v50 = vpack.c.bf16 %v8097_v58, %v8095_v36  ;;  %v8101_v60 = vand.u32 4294901760, %v8100_v31  ;;  %v8102_v63 = vld [vmem:[#allocation100_spill] sm:$0xff]  ;;  %v8106_v37 = vld [vmem:[#allocation102_spill] sm:$0xff] }
 0x2ff   : > { %4633 = vmatprep.subr.bf16.mxu1 %v4632_v18  ;;  %v8103_v8 = vand.u32 4294901760, %v8102_v63  ;;  %v8107_v2 = vand.u32 4294901760, %v8106_v37 }
 0x300   : > { %v4842_v41 = vpack.c.bf16 %v8101_v60, %v8099_v14 }
 0x301   : > { %4831 = vmatpush1.bf16.msra.mxu0 %v4830_v32  ;;  %v4646_v42 = vpack.c.bf16 %v8105_v10, %v8103_v8  ;;  %v4648_v18 = vpack.c.bf16 %v8109_v61, %v8107_v2  ;;  %v8112_v32 = vand.u32 4294901760, %v8111_v19 }
 0x302   : > { %4635 = vmatpush1.bf16.msra.mxu1 %v4634_v44  ;;  %4833 = vmatprep.subr.bf16.mxu0 %v4832_v6  ;;  %v8117_v6 = vld [vmem:[#allocation68_spill] sm:$0xff] }
 0x303   : > { %4637 = vmatprep.subr.bf16.mxu1 %v4636_v15  ;;  %v4650_v44 = vpack.c.bf16 %v8114_v54, %v8112_v32  ;;  %v8121_v15 = vld [vmem:[#allocation70_spill] sm:$0xff] }
 0x305   : > { %4835 = vmatpush1.bf16.msra.mxu0 %v4834_v53  ;;  %v8125_v53 = vld [vmem:[#allocation74_spill] sm:$0xff] }
 0x306   : > { %4639 = vmatpush1.bf16.msra.mxu1 %v4638_v25  ;;  %4837 = vmatprep.subr.bf16.mxu0 %v4836_v59  ;;  %v8128_v25 = vld [vmem:[#allocation77_spill] sm:$0xff] }
 0x307   : > { %4641 = vmatprep.subr.bf16.mxu1 %v4640_v27  ;;  %v8132_v59 = vld [vmem:[#allocation81_spill] sm:$0xff]  ;;  %v8138_v27 = vld [vmem:[#allocation86_spill] sm:$0xff] }
 0x309   : > { %4839 = vmatpush1.bf16.msra.mxu0 %v4838_v52  ;;  %v8141_v52 = vld [vmem:[#allocation89_spill] sm:$0xff] }
 0x30a   : > { %4643 = vmatpush1.bf16.msra.mxu1 %v4642_v12  ;;  %4841 = vmatprep.subr.bf16.mxu0 %v4840_v13 }
 0x30b   : > { %4645 = vmatprep.subr.bf16.mxu1 %v4644_v50 }
 0x30d   : > { %4843 = vmatpush1.bf16.msra.mxu0 %v4842_v41 }
 0x30e   : > { %4647 = vmatpush1.bf16.msra.mxu1 %v4646_v42  ;;  %4845 = vmatprep.subr.bf16.mxu0 %v8110_v28 }
 0x30f   : > { %4649 = vmatprep.subr.bf16.mxu1 %v4648_v18 }
 0x310   : > { %3980 = vmatmul.mubr.f32.vlgmr.msra.gmra.mrb[2].mxu0 %v8115_v29 }
 0x311   : > { %4847 = vmatpush1.bf16.msra.mxu0 %v8116_v17  ;;  %4082 = vmatprep.mubr.f32.mxu0 %v7922_v39 }
 0x312   : > { %4651 = vmatpush1.bf16.msra.mxu1 %v4650_v44  ;;  %4849 = vmatprep.subr.bf16.mxu0 %v8117_v6 }
 0x313   : > { %4653 = vmatprep.subr.bf16.mxu1 %v8118_v3 }
 0x315   : > { %3125 = vmatmul.mubr.f32.vlgmr.msra.gmra.mrb[2].mxu1 %v8119_v56  ;;  %4851 = vmatpush1.bf16.msra.mxu0 %v8120_v22 }
 0x316   : > { %4655 = vmatpush1.bf16.msra.mxu1 %v8121_v15  ;;  %4853 = vmatprep.subr.bf16.mxu0 %v8122_v11 }
 0x317   : > { %4657 = vmatprep.subr.bf16.mxu1 %v8123_v21  ;;  %3227 = vmatprep.mubr.f32.mxu1 %v7922_v39  ;;  %v8134_v39 = vld [vmem:[#allocation83_spill] sm:$0xff] }
 0x319   : > { %4855 = vmatpush1.bf16.msra.mxu0 %v8124_v51 }
 0x31a   : > { %4659 = vmatpush1.bf16.msra.mxu1 %v8125_v53  ;;  %4857 = vmatprep.subr.bf16.mxu0 %v8126_v23 }
 0x31b   : > { %4661 = vmatprep.subr.bf16.mxu1 %v8127_v45 }
 0x31d   : > { %4859 = vmatpush1.bf16.msra.mxu0 %v8128_v25 }
 0x31e   : > { %4663 = vmatpush1.bf16.msra.mxu1 %v8129_v46  ;;  %4861 = vmatprep.subr.bf16.mxu0 %v8130_v5 }
 0x31f   : > { %4665 = vmatprep.subr.bf16.mxu1 %v8131_v20 }
 0x321   : > { %4863 = vmatpush1.bf16.msra.mxu0 %v8132_v59 }
 0x322   : > { %4667 = vmatpush1.bf16.msra.mxu1 %v8133_v43  ;;  %4865 = vmatprep.subr.bf16.mxu0 %v8134_v39  ;;  %v4093_v7 = vpop.permute.xlu1 %4092 }
 0x323   : > { %4669 = vmatprep.subr.bf16.mxu1 %v8135_v33 }
 0x325   : > { %4867 = vmatpush1.bf16.msra.mxu0 %v8136_v40 }
 0x326   : > { %4671 = vmatpush1.bf16.msra.mxu1 %v8138_v27  ;;  %4869 = vmatprep.subr.bf16.mxu0 %v8139_v47 }
 0x327   : > { %4673 = vmatprep.subr.bf16.mxu1 %v8140_v57 }
 0x329   : > { %4871 = vmatpush1.bf16.msra.mxu0 %v8141_v52 }
 0x32a   : > { %4675 = vmatpush1.bf16.msra.mxu1 %v8142_v34  ;;  %4873 = vmatprep.subr.bf16.mxu0 %v8143_v49 }
 0x32b   : > { %4677 = vmatprep.subr.bf16.mxu1 %v8030_v48 }
 0x32d   : > { %4875 = vmatpush1.bf16.msra.mxu0 %v8031_v26 }
 0x32e   : > { %4679 = vmatpush1.bf16.msra.mxu1 %v8034_v35  ;;  %v4106_v35 = vld [vmem:[%s464_s5 + $0x8] sm:$0xff] }
 0x32f   : > { %4681 = vmatprep.subr.bf16.mxu1 %v8037_v0  ;;  %v4105_v0 = vld [vmem:[%s464_s5] sm:$0xff]  ;;  %4108 = vst [vmem:[%s449_s16 + $0x18] sm:$0xff] %v4106_v35  ;;  %s5227_s5 = scalar_lea.vmem %s5226_s17, 1024 }
 0x330   : > { %4084 = vmatmul.mubr.f32.vlgmr.msra.gmra.mrb[2].mxu0 %v8115_v29  ;;  %4107 = vst [vmem:[%s449_s16 + $0x10] sm:$0xff] %v4105_v0  ;;  %p5229_p0 = scmp.lt.s32.totalorder %s5227_s5, %s5221_s3 }
 0x332   : > { %4683 = vmatpush1.bf16.msra.mxu1 %v8043_v4  ;;  %p5230_p6 = por %p5229_p0, %p5228_p8 }
 0x334   : > { %p5231_p5 = pnand %p5230_p6, %p5224_p3 }
 0x335   : > { %3229 = vmatmul.mubr.f32.vlgmr.msra.gmra.mrb[2].mxu1 %v8119_v56 }
 0x403   : > { %v4085_v48 = vpop.f32.mrb[2].mxu0 }
 0x404   : > { %v4087_v26 = vpop.f32.mrb[3].mxu0 }
 0x408   : > { %v3230_v4 = vpop.f32.mrb[2].mxu1 }
 0x409   : > { %v4876_v16 = vadd.f32 %v4085_v48, %v3230_v4  ;;  %v3232_v12 = vpop.f32.mrb[3].mxu1 }
 0x40a   : > { %v4877_v62 = vadd.f32 %v4087_v26, %v3232_v12 }
 0x40b   : > { %v4095_v38 = vadd.f32 %v4876_v16, %v4093_v7 }
 0x40c   : > { %v4096_v13 = vadd.f32 %v4877_v62, %v4093_v7 }
 0x40d   : > { %vm4097_vm7 = vcmp.gt.f32.partialorder %v4095_v38, 0.0  ;;  %v4099_v36 = vmul.f32 0.1, %v4095_v38 }
 0x40e   : > { %vm4098_vm8 = vcmp.gt.f32.partialorder %v4096_v13, 0.0  ;;  %v4100_v1 = vmul.f32 0.1, %v4096_v13 }
 0x40f   : > { %v4101_v58 = vsel %vm4097_vm7, %v4095_v38, %v4099_v36 }
 0x410   : > { %v4102_v50 = vsel %vm4098_vm8, %v4096_v13, %v4100_v1  ;;  %4103 = vst [vmem:[%s449_s16] sm:$0xff] %v4101_v58 }
 0x411   : > { %4104 = vst [vmem:[%s449_s16 + $0x8] sm:$0xff] %v4102_v50 }
 0x412   : > { %5234 = shalt.err (!%p5231_p5)
}
 0x413   : > { %s5235_s16 = scalar_lea.hbm %s7272_s27, 512  ;;  %s5239_s22 = scalar_lea.hbm %s8146_s1, 2048 }
 0x414   : > { %p5236_p9 = scmp.ne.s32.totalorder %s7272_s27, %s5235_s16  ;;  %p5240_p4 = scmp.lt.u32.totalorder %s7272_s27, %s8146_s1 }
 0x415   : > { %p5241_p10 = scmp.lt.u32.totalorder %s5239_s22, %s5235_s16  ;;  %p5243_p13 = scmp.lt.u32.totalorder %s5235_s16, %s7272_s27 }
 0x416   : > { %p5237_p7 = pnand %p5236_p9, %p8147_p12 }
 0x417   : > { %p5242_p2 = por %p5241_p10, %p5240_p4 }
 0x418   : > { %p5238_p11 = pneg %p5237_p7 }
 0x419   : > { %p5244_p1 = por %p5243_p13, %p5242_p2 }
 0x41b   : > { %p5245_p3 = pnand %p5244_p1, %p5238_p11 }
 0x41d   : > { %5248 = shalt.err (!%p5245_p3)
}
 0x41e   : > { %s5398_s10 = smov 256   ;;  %s5399_s3 = smov 512  }
 0x41f   : > { %s5400_s4 = smov 16  }
 0x420   : > { %4952 = dma.vmem_to_hbm [thread:$0]  (%p8147_p12), %s7267_s18, 512, %s7272_s27, %s4110_s24, %s5398_s10, %s5399_s3, %s5400_s4  }
 0x421 PF: > { %p4975_p8 = scmp.ge.s32.totalorder %s5383_s14, 2  ;;  %s4140_s17 = sand.u32 1, %s5355_s30  }
 0x422   : > { %p8148_p0 = scmp.ne.s32.totalorder %s7661_s21, 0  ;;  %s4141_s5 = scalar_lea.sflag [#allocation4], %s4140_s17 }
 0x424   : > { %p4969_p6 = pnand %p4975_p8, %p8148_p0 }
 0x426   : > { %5322 = dma.done.wait (!%p4969_p6), %s4141_s5, 512  }
 0x427   : > { %5324 = vsyncadd (!%p4969_p6), %s4141_s5, 4294966784  ;;  %s27_s14 = sadd.s32 1, %s5383_s14   ;;  %s8150_s19 = sld [smem:[#allocation21_spill]] }
 0x428   : > { %p7303_p5 = scmp.ge.s32.totalorder %s27_s14, 6   ;;  %s8151_s20 = sld [smem:[#allocation22_spill]] }
 0x429   : > { %s8152_s21 = sld [smem:[#allocation18_spill]]  ;;  %s8153_s18 = sld [smem:[#allocation19_spill]] }
 0x42a   : > { %s8154_s24 = smov %s5335_s25  ;;  %s8155_s25 = smov %s5339_s26 }
 0x42b   : > { %s8156_s26 = smov %s5722_s0  ;;  %s8157_s27 = smov %s5347_s28 }
 0x42c   : > { %s8158_s28 = smov %s5351_s29  ;;  %s8160_s30 = smov %s5359_s8 }
 0x42d   : > { %s8159_s29 = smov %s8150_s19  ;;  %s8161_s8 = smov %s5363_s9 }
 0x42e   : > { %s8162_s9 = smov %s8151_s20  ;;  %s8163_s10 = smov %s5375_s12 }
 0x42f   : > { %s8164_s11 = smov %s5379_s13  ;;  %s8165_s12 = smov %s8152_s21 }
 0x430   : > { %s8166_s13 = smov %s8153_s18  ;;  %26 = sbr.rel (!%p7303_p5) target bundleno = 21 (0x15), region = 128 }
 0x437   :  { %4146 = vsyncpa [#allocation3], 1 }
 0x438   :  { %4148 = vsyncpa [#allocation3 + $0x1], 1 }
 0x439   :  { %4149 = vsyncpa [#allocation6], 1 }
 0x43a   :  { %4151 = vsyncpa [#allocation6 + $0x1], 1 }
 0x43b   :  { %4152 = vsyncpa [#allocation9], 1 }
 0x43c   :  { %4153 = vsyncpa [#allocation4], 1 }
 0x43d   :  { %4155 = vsyncpa [#allocation4 + $0x1], 1 }

</bundles_post_ra>
